<compile_context>
chip_gen: v6e
topology: v6e:2x2x1
jax: 0.10.0
libtpu: 0.0.40
codegen_flags: <defaults>
</compile_context>

<pallas_src>
import functools

import jax
import jax.numpy as jnp
from jax import lax
from jax.experimental import pallas as pl
from jax.experimental.pallas import tpu as pltpu

# ---- small, module-consistent hyperparameters (scaled down from the spec) -----
BATCH = 2
SEQ_T = 8                          # T <= block_size
N_EMBD = 64                        # C (512 in the real model)
NUM_HEADS = 4
HEAD_SIZE = N_EMBD // NUM_HEADS    # 16
FWD_MUL = 4
HIDDEN = FWD_MUL * N_EMBD          # 256
LN_EPS = 1e-5


def _detect_config(batch):
    """(per-step batch block, MXU operand dtype) based on the TPU generation.

    * single-TC chips (v5e / v6e): fold the whole batch into one grid step
      (grid is a serial loop on one TensorCore -> fewer steps = less overhead).
    * dual-TC chips (v7x): keep grid=(B,) so each TensorCore takes batch elems.
    * v6e / v7x: feed the MXU bf16 operands (accumulation stays f32).
    """
    try:
        kind = jax.devices()[0].device_kind.lower()
    except Exception:
        kind = ""
    dual_tc = ("v7" in kind) or ("tpu7" in kind)
    bb = 1 if (dual_tc and batch > 1) else batch
    use_bf16 = dual_tc or ("v6" in kind)
    return bb, (jnp.bfloat16 if use_bf16 else jnp.float32)


# ----- Pallas kernel ------------------------------------------------------------
def _block_kernel(x_ref, g1_ref, b1_ref, wqkv_ref, wp_ref, bp_ref,
                  g2_ref, b2_ref, wfc_ref, bfc_ref, wff_ref, bff_ref,
                  o_ref, *, num_heads):
    BB, T, C = x_ref.shape
    hs = C // num_heads
    N = BB * T
    cdt = wqkv_ref.dtype                       # MXU operand dtype (f32 or bf16)

    def mxu(a, b):
        return jnp.dot(a.astype(cdt), b.astype(cdt),
                       preferred_element_type=jnp.float32)

    def layernorm(z, g_ref, b_ref):            # g/b refs are (1, C); math in f32
        mu = jnp.mean(z, axis=-1, keepdims=True)
        zc = z - mu
        var = jnp.mean(zc * zc, axis=-1, keepdims=True)
        return zc * lax.rsqrt(var + LN_EPS) * g_ref[...] + b_ref[...]

    x = x_ref[...].reshape(N, C).astype(jnp.float32)      # token-major (N, C)

    # ------------------------- self-attention branch ---------------------------
    h1 = layernorm(x, g1_ref, b1_ref)

    # one fused, lane-dense QKV GEMM: (N, C) @ (C, 3C)
    qkv = mxu(h1, wqkv_ref[...]).reshape(BB, T, 3 * C)

    scale = C ** -0.5                                     # torch: C**(-0.5), C = n_embd
    row = lax.broadcasted_iota(jnp.int32, (T, T), 0)
    col = lax.broadcasted_iota(jnp.int32, (T, T), 1)
    causal = (col <= row)[None, :, :]                     # (1, T, T)

    # accumulate the output projection per head (no lane concat / relayout)
    sa = jnp.zeros((N, C), jnp.float32)
    for h in range(num_heads):                            # static, tiny unroll
        lo = h * hs
        q = qkv[:, :, lo:lo + hs]                         # (BB, T, hs)
        k = qkv[:, :, C + lo:C + lo + hs]
        v = qkv[:, :, 2 * C + lo:2 * C + lo + hs]

        # contract last dims directly: no explicit k transpose
        s = jnp.einsum("bqd,bkd->bqk", q.astype(cdt), k.astype(cdt),
                       preferred_element_type=jnp.float32) * scale
        s = jnp.where(causal, s, -jnp.inf)
        s = s - jnp.max(s, axis=-1, keepdims=True)
        p = jnp.exp(s)
        p = p * pl.reciprocal(jnp.sum(p, axis=-1, keepdims=True), approx=True)
        # attention-weight dropout: identity in eval mode

        pv = jnp.einsum("bqk,bkd->bqd", p.astype(cdt), v.astype(cdt),
                        preferred_element_type=jnp.float32)      # (BB, T, hs)
        sa = sa + mxu(pv.reshape(N, hs), wp_ref[lo:lo + hs, :])  # (N, C)

    sa = sa + bp_ref[...]
    # output-projection dropout: identity in eval mode
    x = x + sa                                            # residual 1

    # --------------------------- feed-forward branch ----------------------------
    h2 = layernorm(x, g2_ref, b2_ref)
    fc = jnp.maximum(mxu(h2, wfc_ref[...]) + bfc_ref[...], 0.0)   # (N, 4C), ReLU
    ff = mxu(fc, wff_ref[...]) + bff_ref[...]                     # (N, C)
    # ffwd dropout: identity in eval mode
    x = x + ff                                            # residual 2

    # NOTE: C=64 (<128 lanes) -> masked stores; lane-dense at real n_embd=512.
    o_ref[...] = x.reshape(BB, T, C).astype(o_ref.dtype)


# ----- wrapper ------------------------------------------------------------------
def transformer_block(x, params, *, batch_block, compute_dtype):
    (g1, b1, wq, wk, wv, wp, bp, g2, b2, wfc, bfc, wff, bff) = params
    B, T, C = x.shape
    H, hs, _ = wq.shape
    assert B % batch_block == 0

    # torch Linear stores (out, in); kernel wants (in, out).  Fuse QKV columns.
    def heads_to_cols(w):                                 # (H, hs, C) -> (C, H*hs)
        return jnp.transpose(w, (2, 0, 1)).reshape(C, H * hs)

    wqkv = jnp.concatenate([heads_to_cols(wq), heads_to_cols(wk),
                            heads_to_cols(wv)], axis=1).astype(compute_dtype)
    wp_t = wp.T.astype(compute_dtype)                     # (C, C)
    wfc_t = wfc.T.astype(compute_dtype)                   # (C, 4C)
    wff_t = wff.T.astype(compute_dtype)                   # (4C, C)

    row2 = lambda a: a.reshape(1, -1).astype(jnp.float32)
    g1_, b1_, bp_, g2_, b2_, bfc_, bff_ = map(row2, (g1, b1, bp, g2, b2, bfc, bff))

    BB = batch_block
    grid = (B // BB,)

    def full(shape):                                      # whole-array block, fixed
        return pl.BlockSpec(shape, lambda i, _n=len(shape): (0,) * _n)

    kernel = functools.partial(_block_kernel, num_heads=H)
    return pl.pallas_call(
        kernel,
        out_shape=jax.ShapeDtypeStruct((B, T, C), x.dtype),
        grid_spec=pltpu.PrefetchScalarGridSpec(
            num_scalar_prefetch=0,
            grid=grid,
            in_specs=[
                pl.BlockSpec((BB, T, C), lambda i: (i, 0, 0)),   # x
                full((1, C)), full((1, C)),                      # ln1 gamma/beta
                full((C, 3 * C)),                                # fused QKV weight
                full((C, C)), full((1, C)),                      # attn out-proj W, b
                full((1, C)), full((1, C)),                      # ln2 gamma/beta
                full((C, FWD_MUL * C)), full((1, FWD_MUL * C)),  # ffn fc W, b
                full((FWD_MUL * C, C)), full((1, C)),            # ffn proj W, b
            ],
            out_specs=pl.BlockSpec((BB, T, C), lambda i: (i, 0, 0)),
        ),
        compiler_params=pltpu.CompilerParams(
            dimension_semantics=("parallel",)),
        # VMEM footprint here is well under 1 MiB on every generation; re-derive
        # block sizes / vmem_limit_bytes if scaled to n_embd=512, T=256.
    )(x, g1_, b1_, wqkv, wp_t, bp_, g2_, b2_, wfc_t, bfc_, wff_t, bff_)


# ----- pure-JAX reference (mirrors the PyTorch Block forward, eval mode) ---------
def reference(x, params):
    (g1, b1, wq, wk, wv, wp, bp, g2, b2, wfc, bfc, wff, bff) = params
    B, T, C = x.shape

    def ln(z, g, b):
        mu = z.mean(-1, keepdims=True)
        var = ((z - mu) ** 2).mean(-1, keepdims=True)
        return (z - mu) / jnp.sqrt(var + LN_EPS) * g + b

    h1 = ln(x, g1, b1)
    mask = jnp.tril(jnp.ones((T, T), dtype=bool))
    heads = []
    for h in range(wq.shape[0]):
        q = h1 @ wq[h].T
        k = h1 @ wk[h].T
        v = h1 @ wv[h].T
        wei = (q @ jnp.swapaxes(k, -2, -1)) * (C ** -0.5)
        wei = jnp.where(mask, wei, -jnp.inf)
        wei = jax.nn.softmax(wei, axis=-1)
        heads.append(wei @ v)
    sa = jnp.concatenate(heads, axis=-1) @ wp.T + bp
    x = x + sa
    h2 = ln(x, g2, b2)
    ff = jnp.maximum(h2 @ wfc.T + bfc, 0.0) @ wff.T + bff
    return x + ff


if __name__ == "__main__":
    key = jax.random.PRNGKey(0)
    ks = jax.random.split(key, 14)

    x = jax.random.normal(ks[0], (BATCH, SEQ_T, N_EMBD), dtype=jnp.float32)

    lim_c = 1.0 / (N_EMBD ** 0.5)
    lim_h = 1.0 / (HIDDEN ** 0.5)
    u = lambda k, shape, lim: jax.random.uniform(k, shape, jnp.float32, -lim, lim)

    g1 = 1.0 + 0.1 * jax.random.normal(ks[1], (N_EMBD,), jnp.float32)
    b1 = 0.1 * jax.random.normal(ks[2], (N_EMBD,), jnp.float32)
    wq = u(ks[3], (NUM_HEADS, HEAD_SIZE, N_EMBD), lim_c)
    wk = u(ks[4], (NUM_HEADS, HEAD_SIZE, N_EMBD), lim_c)
    wv = u(ks[5], (NUM_HEADS, HEAD_SIZE, N_EMBD), lim_c)
    wp = u(ks[6], (N_EMBD, N_EMBD), lim_c)
    bp = u(ks[7], (N_EMBD,), lim_c)
    g2 = 1.0 + 0.1 * jax.random.normal(ks[8], (N_EMBD,), jnp.float32)
    b2 = 0.1 * jax.random.normal(ks[9], (N_EMBD,), jnp.float32)
    wfc = u(ks[10], (HIDDEN, N_EMBD), lim_c)
    bfc = u(ks[11], (HIDDEN,), lim_c)
    wff = u(ks[12], (N_EMBD, HIDDEN), lim_h)
    bff = u(ks[13], (N_EMBD,), lim_h)

    params = (g1, b1, wq, wk, wv, wp, bp, g2, b2, wfc, bfc, wff, bff)

    bb, cdt = _detect_config(BATCH)
    out = transformer_block(x, params, batch_block=bb, compute_dtype=cdt)
    out = jax.block_until_ready(out)

    ref = reference(x, params)
    tol = 5e-2 if cdt == jnp.bfloat16 else 5e-3
    assert out.shape == (BATCH, SEQ_T, N_EMBD)
    err = float(jnp.max(jnp.abs(out - ref)))
    assert jnp.allclose(out, ref, atol=tol, rtol=tol), f"mismatch vs reference (max err {err})"

    print("KERNEL_OK")
</pallas_src>

<mosaic_0001>
module attributes {stable_mosaic.version = 11 : i64} {
  func.func @_block_kernel(%arg0: i32, %arg1: memref<2x8x64xf32, #tpu.memory_space<vmem>>, %arg2: memref<1x64xf32, #tpu.memory_space<vmem>>, %arg3: memref<1x64xf32, #tpu.memory_space<vmem>>, %arg4: memref<64x192xf32, #tpu.memory_space<vmem>>, %arg5: memref<64x64xf32, #tpu.memory_space<vmem>>, %arg6: memref<1x64xf32, #tpu.memory_space<vmem>>, %arg7: memref<1x64xf32, #tpu.memory_space<vmem>>, %arg8: memref<1x64xf32, #tpu.memory_space<vmem>>, %arg9: memref<64x256xf32, #tpu.memory_space<vmem>>, %arg10: memref<1x256xf32, #tpu.memory_space<vmem>>, %arg11: memref<256x64xf32, #tpu.memory_space<vmem>>, %arg12: memref<1x64xf32, #tpu.memory_space<vmem>>, %arg13: memref<2x8x64xf32, #tpu.memory_space<vmem>>) attributes {dimension_semantics = [#tpu.dimension_semantics<parallel>], iteration_bounds = array<i64: 1>, scalar_prefetch = 0 : i64, scratch_operands = 0 : i64, tpu.core_type = #tpu.core_type<tc>, window_params = [{transform_indices = @transform_0, window_bounds = array<i64: 2, 8, 64>}, {pipeline_mode = #tpu.pipeline_mode<synchronous>, transform_indices = @transform_1, window_bounds = array<i64: 1, 64>}, {pipeline_mode = #tpu.pipeline_mode<synchronous>, transform_indices = @transform_2, window_bounds = array<i64: 1, 64>}, {pipeline_mode = #tpu.pipeline_mode<synchronous>, transform_indices = @transform_3, window_bounds = array<i64: 64, 192>}, {pipeline_mode = #tpu.pipeline_mode<synchronous>, transform_indices = @transform_4, window_bounds = array<i64: 64, 64>}, {pipeline_mode = #tpu.pipeline_mode<synchronous>, transform_indices = @transform_5, window_bounds = array<i64: 1, 64>}, {pipeline_mode = #tpu.pipeline_mode<synchronous>, transform_indices = @transform_6, window_bounds = array<i64: 1, 64>}, {pipeline_mode = #tpu.pipeline_mode<synchronous>, transform_indices = @transform_7, window_bounds = array<i64: 1, 64>}, {pipeline_mode = #tpu.pipeline_mode<synchronous>, transform_indices = @transform_8, window_bounds = array<i64: 64, 256>}, {pipeline_mode = #tpu.pipeline_mode<synchronous>, transform_indices = @transform_9, window_bounds = array<i64: 1, 256>}, {pipeline_mode = #tpu.pipeline_mode<synchronous>, transform_indices = @transform_10, window_bounds = array<i64: 256, 64>}, {pipeline_mode = #tpu.pipeline_mode<synchronous>, transform_indices = @transform_11, window_bounds = array<i64: 1, 64>}, {transform_indices = @transform_12, window_bounds = array<i64: 2, 8, 64>}]} {
    %c0 = arith.constant 0 : index
    %c0_0 = arith.constant 0 : index
    %c0_1 = arith.constant 0 : index
    %0 = vector.load %arg1[%c0, %c0_0, %c0_1] : memref<2x8x64xf32, #tpu.memory_space<vmem>>, vector<2x8x64xf32>
    %1 = vector.shape_cast %0 : vector<2x8x64xf32> to vector<16x64xf32>
    %cst = arith.constant dense<0.000000e+00> : vector<16xf32>
    %2 = vector.multi_reduction <add>, %1, %cst [1] : vector<16x64xf32> to vector<16xf32>
    %3 = vector.shape_cast %2 : vector<16xf32> to vector<16x1xf32>
    %cst_2 = arith.constant 6.400000e+01 : f32
    %4 = vector.broadcast %cst_2 : f32 to vector<16x1xf32>
    %5 = arith.divf %3, %4 : vector<16x1xf32>
    %6 = vector.broadcast %5 : vector<16x1xf32> to vector<16x64xf32>
    %7 = arith.subf %1, %6 : vector<16x64xf32>
    %8 = arith.mulf %7, %7 : vector<16x64xf32>
    %cst_3 = arith.constant dense<0.000000e+00> : vector<16xf32>
    %9 = vector.multi_reduction <add>, %8, %cst_3 [1] : vector<16x64xf32> to vector<16xf32>
    %10 = vector.shape_cast %9 : vector<16xf32> to vector<16x1xf32>
    %cst_4 = arith.constant 6.400000e+01 : f32
    %11 = vector.broadcast %cst_4 : f32 to vector<16x1xf32>
    %12 = arith.divf %10, %11 : vector<16x1xf32>
    %cst_5 = arith.constant 9.99999974E-6 : f32
    %13 = vector.broadcast %cst_5 : f32 to vector<16x1xf32>
    %14 = arith.addf %12, %13 : vector<16x1xf32>
    %15 = math.rsqrt %14 : vector<16x1xf32>
    %16 = vector.broadcast %15 : vector<16x1xf32> to vector<16x64xf32>
    %17 = arith.mulf %7, %16 : vector<16x64xf32>
    %c0_6 = arith.constant 0 : index
    %c0_7 = arith.constant 0 : index
    %18 = vector.load %arg2[%c0_6, %c0_7] : memref<1x64xf32, #tpu.memory_space<vmem>>, vector<1x64xf32>
    %19 = vector.broadcast %18 : vector<1x64xf32> to vector<16x64xf32>
    %20 = arith.mulf %17, %19 : vector<16x64xf32>
    %c0_8 = arith.constant 0 : index
    %c0_9 = arith.constant 0 : index
    %21 = vector.load %arg3[%c0_8, %c0_9] : memref<1x64xf32, #tpu.memory_space<vmem>>, vector<1x64xf32>
    %22 = vector.broadcast %21 : vector<1x64xf32> to vector<16x64xf32>
    %23 = arith.addf %20, %22 : vector<16x64xf32>
    %c0_10 = arith.constant 0 : index
    %c0_11 = arith.constant 0 : index
    %24 = vector.load %arg4[%c0_10, %c0_11] : memref<64x192xf32, #tpu.memory_space<vmem>>, vector<64x192xf32>
    %cst_12 = arith.constant dense<0.000000e+00> : vector<16x192xf32>
    %25 = tpu.matmul %23, %24, %cst_12 {dimension_numbers = #tpu.dot_dimension_numbers<[1], [0], [0], [1], [0, 0, 1, 1], [], []>} : vector<16x64xf32>, vector<64x192xf32>, vector<16x192xf32> -> vector<16x192xf32>
    %26 = vector.shape_cast %25 : vector<16x192xf32> to vector<2x8x192xf32>
    %27 = tpu.iota {dimensions = array<i32: 0>} : vector<8x8xi32>
    %28 = tpu.iota {dimensions = array<i32: 1>} : vector<8x8xi32>
    %29 = arith.cmpi sle, %28, %27 : vector<8x8xi32>
    %30 = vector.shape_cast %29 : vector<8x8xi1> to vector<1x8x8xi1>
    %cst_13 = arith.constant 0.000000e+00 : f32
    %31 = vector.broadcast %cst_13 : f32 to vector<16x64xf32>
    %32 = vector.extract_strided_slice %26 {offsets = [0, 0, 0], sizes = [2, 8, 16], strides = [1, 1, 1]} : vector<2x8x192xf32> to vector<2x8x16xf32>
    %33 = vector.extract_strided_slice %26 {offsets = [0, 0, 64], sizes = [2, 8, 16], strides = [1, 1, 1]} : vector<2x8x192xf32> to vector<2x8x16xf32>
    %34 = vector.extract_strided_slice %26 {offsets = [0, 0, 128], sizes = [2, 8, 16], strides = [1, 1, 1]} : vector<2x8x192xf32> to vector<2x8x16xf32>
    "tpu.trace_start"() <{level = 10 : i32, message = "bqd,bkd->bqk"}> : () -> ()
    %cst_14 = arith.constant dense<0.000000e+00> : vector<2x8x8xf32>
    %35 = tpu.matmul %32, %33, %cst_14 {dimension_numbers = #tpu.dot_dimension_numbers<[2], [2], [1], [1], [0, 0, 0, 1, 1, 1], [0], [0]>} : vector<2x8x16xf32>, vector<2x8x16xf32>, vector<2x8x8xf32> -> vector<2x8x8xf32>
    "tpu.trace_stop"() : () -> ()
    %cst_15 = arith.constant 1.250000e-01 : f32
    %36 = vector.broadcast %cst_15 : f32 to vector<2x8x8xf32>
    %37 = arith.mulf %35, %36 : vector<2x8x8xf32>
    %cst_16 = arith.constant 0xFF800000 : f32
    %38 = vector.shape_cast %30 : vector<1x8x8xi1> to vector<1x8x8xi1>
    %39 = vector.broadcast %38 : vector<1x8x8xi1> to vector<2x8x8xi1>
    %40 = vector.broadcast %cst_16 : f32 to vector<2x8x8xf32>
    %41 = arith.select %39, %37, %40 : vector<2x8x8xi1>, vector<2x8x8xf32>
    %cst_17 = arith.constant dense<0xFF800000> : vector<2x8xf32>
    %42 = vector.multi_reduction <maximumf>, %41, %cst_17 [2] : vector<2x8x8xf32> to vector<2x8xf32>
    %43 = vector.shape_cast %42 : vector<2x8xf32> to vector<2x8x1xf32>
    %44 = vector.broadcast %43 : vector<2x8x1xf32> to vector<2x8x8xf32>
    %45 = arith.subf %41, %44 : vector<2x8x8xf32>
    %46 = math.exp %45 : vector<2x8x8xf32>
    %cst_18 = arith.constant dense<0.000000e+00> : vector<2x8xf32>
    %47 = vector.multi_reduction <add>, %46, %cst_18 [2] : vector<2x8x8xf32> to vector<2x8xf32>
    %48 = vector.shape_cast %47 : vector<2x8xf32> to vector<2x8x1xf32>
    %49 = tpu.reciprocal %48 {approx = true} : vector<2x8x1xf32> -> vector<2x8x1xf32>
    %50 = vector.broadcast %49 : vector<2x8x1xf32> to vector<2x8x8xf32>
    %51 = arith.mulf %46, %50 : vector<2x8x8xf32>
    "tpu.trace_start"() <{level = 10 : i32, message = "bqk,bkd->bqd"}> : () -> ()
    %cst_19 = arith.constant dense<0.000000e+00> : vector<2x8x16xf32>
    %52 = tpu.matmul %51, %34, %cst_19 {dimension_numbers = #tpu.dot_dimension_numbers<[2], [1], [1], [2], [0, 0, 0, 1, 1, 2], [0], [0]>} : vector<2x8x8xf32>, vector<2x8x16xf32>, vector<2x8x16xf32> -> vector<2x8x16xf32>
    "tpu.trace_stop"() : () -> ()
    %53 = vector.shape_cast %52 : vector<2x8x16xf32> to vector<16x16xf32>
    %c0_20 = arith.constant 0 : index
    %c0_21 = arith.constant 0 : index
    %54 = vector.load %arg5[%c0_20, %c0_21] : memref<64x64xf32, #tpu.memory_space<vmem>>, vector<16x64xf32>
    %cst_22 = arith.constant dense<0.000000e+00> : vector<16x64xf32>
    %55 = tpu.matmul %53, %54, %cst_22 {dimension_numbers = #tpu.dot_dimension_numbers<[1], [0], [0], [1], [0, 0, 1, 1], [], []>} : vector<16x16xf32>, vector<16x64xf32>, vector<16x64xf32> -> vector<16x64xf32>
    %56 = arith.addf %31, %55 : vector<16x64xf32>
    %57 = vector.extract_strided_slice %26 {offsets = [0, 0, 16], sizes = [2, 8, 16], strides = [1, 1, 1]} : vector<2x8x192xf32> to vector<2x8x16xf32>
    %58 = vector.extract_strided_slice %26 {offsets = [0, 0, 80], sizes = [2, 8, 16], strides = [1, 1, 1]} : vector<2x8x192xf32> to vector<2x8x16xf32>
    %59 = vector.extract_strided_slice %26 {offsets = [0, 0, 144], sizes = [2, 8, 16], strides = [1, 1, 1]} : vector<2x8x192xf32> to vector<2x8x16xf32>
    "tpu.trace_start"() <{level = 10 : i32, message = "bqd,bkd->bqk"}> : () -> ()
    %cst_23 = arith.constant dense<0.000000e+00> : vector<2x8x8xf32>
    %60 = tpu.matmul %57, %58, %cst_23 {dimension_numbers = #tpu.dot_dimension_numbers<[2], [2], [1], [1], [0, 0, 0, 1, 1, 1], [0], [0]>} : vector<2x8x16xf32>, vector<2x8x16xf32>, vector<2x8x8xf32> -> vector<2x8x8xf32>
    "tpu.trace_stop"() : () -> ()
    %cst_24 = arith.constant 1.250000e-01 : f32
    %61 = vector.broadcast %cst_24 : f32 to vector<2x8x8xf32>
    %62 = arith.mulf %60, %61 : vector<2x8x8xf32>
    %cst_25 = arith.constant 0xFF800000 : f32
    %63 = vector.shape_cast %30 : vector<1x8x8xi1> to vector<1x8x8xi1>
    %64 = vector.broadcast %63 : vector<1x8x8xi1> to vector<2x8x8xi1>
    %65 = vector.broadcast %cst_25 : f32 to vector<2x8x8xf32>
    %66 = arith.select %64, %62, %65 : vector<2x8x8xi1>, vector<2x8x8xf32>
    %cst_26 = arith.constant dense<0xFF800000> : vector<2x8xf32>
    %67 = vector.multi_reduction <maximumf>, %66, %cst_26 [2] : vector<2x8x8xf32> to vector<2x8xf32>
    %68 = vector.shape_cast %67 : vector<2x8xf32> to vector<2x8x1xf32>
    %69 = vector.broadcast %68 : vector<2x8x1xf32> to vector<2x8x8xf32>
    %70 = arith.subf %66, %69 : vector<2x8x8xf32>
    %71 = math.exp %70 : vector<2x8x8xf32>
    %cst_27 = arith.constant dense<0.000000e+00> : vector<2x8xf32>
    %72 = vector.multi_reduction <add>, %71, %cst_27 [2] : vector<2x8x8xf32> to vector<2x8xf32>
    %73 = vector.shape_cast %72 : vector<2x8xf32> to vector<2x8x1xf32>
    %74 = tpu.reciprocal %73 {approx = true} : vector<2x8x1xf32> -> vector<2x8x1xf32>
    %75 = vector.broadcast %74 : vector<2x8x1xf32> to vector<2x8x8xf32>
    %76 = arith.mulf %71, %75 : vector<2x8x8xf32>
    "tpu.trace_start"() <{level = 10 : i32, message = "bqk,bkd->bqd"}> : () -> ()
    %cst_28 = arith.constant dense<0.000000e+00> : vector<2x8x16xf32>
    %77 = tpu.matmul %76, %59, %cst_28 {dimension_numbers = #tpu.dot_dimension_numbers<[2], [1], [1], [2], [0, 0, 0, 1, 1, 2], [0], [0]>} : vector<2x8x8xf32>, vector<2x8x16xf32>, vector<2x8x16xf32> -> vector<2x8x16xf32>
    "tpu.trace_stop"() : () -> ()
    %78 = vector.shape_cast %77 : vector<2x8x16xf32> to vector<16x16xf32>
    %c16 = arith.constant 16 : index
    %c0_29 = arith.constant 0 : index
    %79 = vector.load %arg5[%c16, %c0_29] : memref<64x64xf32, #tpu.memory_space<vmem>>, vector<16x64xf32>
    %cst_30 = arith.constant dense<0.000000e+00> : vector<16x64xf32>
    %80 = tpu.matmul %78, %79, %cst_30 {dimension_numbers = #tpu.dot_dimension_numbers<[1], [0], [0], [1], [0, 0, 1, 1], [], []>} : vector<16x16xf32>, vector<16x64xf32>, vector<16x64xf32> -> vector<16x64xf32>
    %81 = arith.addf %56, %80 : vector<16x64xf32>
    %82 = vector.extract_strided_slice %26 {offsets = [0, 0, 32], sizes = [2, 8, 16], strides = [1, 1, 1]} : vector<2x8x192xf32> to vector<2x8x16xf32>
    %83 = vector.extract_strided_slice %26 {offsets = [0, 0, 96], sizes = [2, 8, 16], strides = [1, 1, 1]} : vector<2x8x192xf32> to vector<2x8x16xf32>
    %84 = vector.extract_strided_slice %26 {offsets = [0, 0, 160], sizes = [2, 8, 16], strides = [1, 1, 1]} : vector<2x8x192xf32> to vector<2x8x16xf32>
    "tpu.trace_start"() <{level = 10 : i32, message = "bqd,bkd->bqk"}> : () -> ()
    %cst_31 = arith.constant dense<0.000000e+00> : vector<2x8x8xf32>
    %85 = tpu.matmul %82, %83, %cst_31 {dimension_numbers = #tpu.dot_dimension_numbers<[2], [2], [1], [1], [0, 0, 0, 1, 1, 1], [0], [0]>} : vector<2x8x16xf32>, vector<2x8x16xf32>, vector<2x8x8xf32> -> vector<2x8x8xf32>
    "tpu.trace_stop"() : () -> ()
    %cst_32 = arith.constant 1.250000e-01 : f32
    %86 = vector.broadcast %cst_32 : f32 to vector<2x8x8xf32>
    %87 = arith.mulf %85, %86 : vector<2x8x8xf32>
    %cst_33 = arith.constant 0xFF800000 : f32
    %88 = vector.shape_cast %30 : vector<1x8x8xi1> to vector<1x8x8xi1>
    %89 = vector.broadcast %88 : vector<1x8x8xi1> to vector<2x8x8xi1>
    %90 = vector.broadcast %cst_33 : f32 to vector<2x8x8xf32>
    %91 = arith.select %89, %87, %90 : vector<2x8x8xi1>, vector<2x8x8xf32>
    %cst_34 = arith.constant dense<0xFF800000> : vector<2x8xf32>
    %92 = vector.multi_reduction <maximumf>, %91, %cst_34 [2] : vector<2x8x8xf32> to vector<2x8xf32>
    %93 = vector.shape_cast %92 : vector<2x8xf32> to vector<2x8x1xf32>
    %94 = vector.broadcast %93 : vector<2x8x1xf32> to vector<2x8x8xf32>
    %95 = arith.subf %91, %94 : vector<2x8x8xf32>
    %96 = math.exp %95 : vector<2x8x8xf32>
    %cst_35 = arith.constant dense<0.000000e+00> : vector<2x8xf32>
    %97 = vector.multi_reduction <add>, %96, %cst_35 [2] : vector<2x8x8xf32> to vector<2x8xf32>
    %98 = vector.shape_cast %97 : vector<2x8xf32> to vector<2x8x1xf32>
    %99 = tpu.reciprocal %98 {approx = true} : vector<2x8x1xf32> -> vector<2x8x1xf32>
    %100 = vector.broadcast %99 : vector<2x8x1xf32> to vector<2x8x8xf32>
    %101 = arith.mulf %96, %100 : vector<2x8x8xf32>
    "tpu.trace_start"() <{level = 10 : i32, message = "bqk,bkd->bqd"}> : () -> ()
    %cst_36 = arith.constant dense<0.000000e+00> : vector<2x8x16xf32>
    %102 = tpu.matmul %101, %84, %cst_36 {dimension_numbers = #tpu.dot_dimension_numbers<[2], [1], [1], [2], [0, 0, 0, 1, 1, 2], [0], [0]>} : vector<2x8x8xf32>, vector<2x8x16xf32>, vector<2x8x16xf32> -> vector<2x8x16xf32>
    "tpu.trace_stop"() : () -> ()
    %103 = vector.shape_cast %102 : vector<2x8x16xf32> to vector<16x16xf32>
    %c32 = arith.constant 32 : index
    %c0_37 = arith.constant 0 : index
    %104 = vector.load %arg5[%c32, %c0_37] : memref<64x64xf32, #tpu.memory_space<vmem>>, vector<16x64xf32>
    %cst_38 = arith.constant dense<0.000000e+00> : vector<16x64xf32>
    %105 = tpu.matmul %103, %104, %cst_38 {dimension_numbers = #tpu.dot_dimension_numbers<[1], [0], [0], [1], [0, 0, 1, 1], [], []>} : vector<16x16xf32>, vector<16x64xf32>, vector<16x64xf32> -> vector<16x64xf32>
    %106 = arith.addf %81, %105 : vector<16x64xf32>
    %107 = vector.extract_strided_slice %26 {offsets = [0, 0, 48], sizes = [2, 8, 16], strides = [1, 1, 1]} : vector<2x8x192xf32> to vector<2x8x16xf32>
    %108 = vector.extract_strided_slice %26 {offsets = [0, 0, 112], sizes = [2, 8, 16], strides = [1, 1, 1]} : vector<2x8x192xf32> to vector<2x8x16xf32>
    %109 = vector.extract_strided_slice %26 {offsets = [0, 0, 176], sizes = [2, 8, 16], strides = [1, 1, 1]} : vector<2x8x192xf32> to vector<2x8x16xf32>
    "tpu.trace_start"() <{level = 10 : i32, message = "bqd,bkd->bqk"}> : () -> ()
    %cst_39 = arith.constant dense<0.000000e+00> : vector<2x8x8xf32>
    %110 = tpu.matmul %107, %108, %cst_39 {dimension_numbers = #tpu.dot_dimension_numbers<[2], [2], [1], [1], [0, 0, 0, 1, 1, 1], [0], [0]>} : vector<2x8x16xf32>, vector<2x8x16xf32>, vector<2x8x8xf32> -> vector<2x8x8xf32>
    "tpu.trace_stop"() : () -> ()
    %cst_40 = arith.constant 1.250000e-01 : f32
    %111 = vector.broadcast %cst_40 : f32 to vector<2x8x8xf32>
    %112 = arith.mulf %110, %111 : vector<2x8x8xf32>
    %cst_41 = arith.constant 0xFF800000 : f32
    %113 = vector.shape_cast %30 : vector<1x8x8xi1> to vector<1x8x8xi1>
    %114 = vector.broadcast %113 : vector<1x8x8xi1> to vector<2x8x8xi1>
    %115 = vector.broadcast %cst_41 : f32 to vector<2x8x8xf32>
    %116 = arith.select %114, %112, %115 : vector<2x8x8xi1>, vector<2x8x8xf32>
    %cst_42 = arith.constant dense<0xFF800000> : vector<2x8xf32>
    %117 = vector.multi_reduction <maximumf>, %116, %cst_42 [2] : vector<2x8x8xf32> to vector<2x8xf32>
    %118 = vector.shape_cast %117 : vector<2x8xf32> to vector<2x8x1xf32>
    %119 = vector.broadcast %118 : vector<2x8x1xf32> to vector<2x8x8xf32>
    %120 = arith.subf %116, %119 : vector<2x8x8xf32>
    %121 = math.exp %120 : vector<2x8x8xf32>
    %cst_43 = arith.constant dense<0.000000e+00> : vector<2x8xf32>
    %122 = vector.multi_reduction <add>, %121, %cst_43 [2] : vector<2x8x8xf32> to vector<2x8xf32>
    %123 = vector.shape_cast %122 : vector<2x8xf32> to vector<2x8x1xf32>
    %124 = tpu.reciprocal %123 {approx = true} : vector<2x8x1xf32> -> vector<2x8x1xf32>
    %125 = vector.broadcast %124 : vector<2x8x1xf32> to vector<2x8x8xf32>
    %126 = arith.mulf %121, %125 : vector<2x8x8xf32>
    "tpu.trace_start"() <{level = 10 : i32, message = "bqk,bkd->bqd"}> : () -> ()
    %cst_44 = arith.constant dense<0.000000e+00> : vector<2x8x16xf32>
    %127 = tpu.matmul %126, %109, %cst_44 {dimension_numbers = #tpu.dot_dimension_numbers<[2], [1], [1], [2], [0, 0, 0, 1, 1, 2], [0], [0]>} : vector<2x8x8xf32>, vector<2x8x16xf32>, vector<2x8x16xf32> -> vector<2x8x16xf32>
    "tpu.trace_stop"() : () -> ()
    %128 = vector.shape_cast %127 : vector<2x8x16xf32> to vector<16x16xf32>
    %c48 = arith.constant 48 : index
    %c0_45 = arith.constant 0 : index
    %129 = vector.load %arg5[%c48, %c0_45] : memref<64x64xf32, #tpu.memory_space<vmem>>, vector<16x64xf32>
    %cst_46 = arith.constant dense<0.000000e+00> : vector<16x64xf32>
    %130 = tpu.matmul %128, %129, %cst_46 {dimension_numbers = #tpu.dot_dimension_numbers<[1], [0], [0], [1], [0, 0, 1, 1], [], []>} : vector<16x16xf32>, vector<16x64xf32>, vector<16x64xf32> -> vector<16x64xf32>
    %131 = arith.addf %106, %130 : vector<16x64xf32>
    %c0_47 = arith.constant 0 : index
    %c0_48 = arith.constant 0 : index
    %132 = vector.load %arg6[%c0_47, %c0_48] : memref<1x64xf32, #tpu.memory_space<vmem>>, vector<1x64xf32>
    %133 = vector.broadcast %132 : vector<1x64xf32> to vector<16x64xf32>
    %134 = arith.addf %131, %133 : vector<16x64xf32>
    %135 = arith.addf %1, %134 : vector<16x64xf32>
    %cst_49 = arith.constant dense<0.000000e+00> : vector<16xf32>
    %136 = vector.multi_reduction <add>, %135, %cst_49 [1] : vector<16x64xf32> to vector<16xf32>
    %137 = vector.shape_cast %136 : vector<16xf32> to vector<16x1xf32>
    %cst_50 = arith.constant 6.400000e+01 : f32
    %138 = vector.broadcast %cst_50 : f32 to vector<16x1xf32>
    %139 = arith.divf %137, %138 : vector<16x1xf32>
    %140 = vector.broadcast %139 : vector<16x1xf32> to vector<16x64xf32>
    %141 = arith.subf %135, %140 : vector<16x64xf32>
    %142 = arith.mulf %141, %141 : vector<16x64xf32>
    %cst_51 = arith.constant dense<0.000000e+00> : vector<16xf32>
    %143 = vector.multi_reduction <add>, %142, %cst_51 [1] : vector<16x64xf32> to vector<16xf32>
    %144 = vector.shape_cast %143 : vector<16xf32> to vector<16x1xf32>
    %cst_52 = arith.constant 6.400000e+01 : f32
    %145 = vector.broadcast %cst_52 : f32 to vector<16x1xf32>
    %146 = arith.divf %144, %145 : vector<16x1xf32>
    %cst_53 = arith.constant 9.99999974E-6 : f32
    %147 = vector.broadcast %cst_53 : f32 to vector<16x1xf32>
    %148 = arith.addf %146, %147 : vector<16x1xf32>
    %149 = math.rsqrt %148 : vector<16x1xf32>
    %150 = vector.broadcast %149 : vector<16x1xf32> to vector<16x64xf32>
    %151 = arith.mulf %141, %150 : vector<16x64xf32>
    %c0_54 = arith.constant 0 : index
    %c0_55 = arith.constant 0 : index
    %152 = vector.load %arg7[%c0_54, %c0_55] : memref<1x64xf32, #tpu.memory_space<vmem>>, vector<1x64xf32>
    %153 = vector.broadcast %152 : vector<1x64xf32> to vector<16x64xf32>
    %154 = arith.mulf %151, %153 : vector<16x64xf32>
    %c0_56 = arith.constant 0 : index
    %c0_57 = arith.constant 0 : index
    %155 = vector.load %arg8[%c0_56, %c0_57] : memref<1x64xf32, #tpu.memory_space<vmem>>, vector<1x64xf32>
    %156 = vector.broadcast %155 : vector<1x64xf32> to vector<16x64xf32>
    %157 = arith.addf %154, %156 : vector<16x64xf32>
    %c0_58 = arith.constant 0 : index
    %c0_59 = arith.constant 0 : index
    %158 = vector.load %arg9[%c0_58, %c0_59] : memref<64x256xf32, #tpu.memory_space<vmem>>, vector<64x256xf32>
    %cst_60 = arith.constant dense<0.000000e+00> : vector<16x256xf32>
    %159 = tpu.matmul %157, %158, %cst_60 {dimension_numbers = #tpu.dot_dimension_numbers<[1], [0], [0], [1], [0, 0, 1, 1], [], []>} : vector<16x64xf32>, vector<64x256xf32>, vector<16x256xf32> -> vector<16x256xf32>
    %c0_61 = arith.constant 0 : index
    %c0_62 = arith.constant 0 : index
    %160 = vector.load %arg10[%c0_61, %c0_62] : memref<1x256xf32, #tpu.memory_space<vmem>>, vector<1x256xf32>
    %161 = vector.broadcast %160 : vector<1x256xf32> to vector<16x256xf32>
    %162 = arith.addf %159, %161 : vector<16x256xf32>
    %cst_63 = arith.constant 0.000000e+00 : f32
    %163 = vector.broadcast %cst_63 : f32 to vector<16x256xf32>
    %164 = arith.maximumf %162, %163 : vector<16x256xf32>
    %c0_64 = arith.constant 0 : index
    %c0_65 = arith.constant 0 : index
    %165 = vector.load %arg11[%c0_64, %c0_65] : memref<256x64xf32, #tpu.memory_space<vmem>>, vector<256x64xf32>
    %cst_66 = arith.constant dense<0.000000e+00> : vector<16x64xf32>
    %166 = tpu.matmul %164, %165, %cst_66 {dimension_numbers = #tpu.dot_dimension_numbers<[1], [0], [0], [1], [0, 0, 1, 1], [], []>} : vector<16x256xf32>, vector<256x64xf32>, vector<16x64xf32> -> vector<16x64xf32>
    %c0_67 = arith.constant 0 : index
    %c0_68 = arith.constant 0 : index
    %167 = vector.load %arg12[%c0_67, %c0_68] : memref<1x64xf32, #tpu.memory_space<vmem>>, vector<1x64xf32>
    %168 = vector.broadcast %167 : vector<1x64xf32> to vector<16x64xf32>
    %169 = arith.addf %166, %168 : vector<16x64xf32>
    %170 = arith.addf %135, %169 : vector<16x64xf32>
    %171 = vector.shape_cast %170 : vector<16x64xf32> to vector<2x8x64xf32>
    %c0_69 = arith.constant 0 : index
    %c0_70 = arith.constant 0 : index
    %c0_71 = arith.constant 0 : index
    %172 = vector.load %arg13[%c0_69, %c0_70, %c0_71] : memref<2x8x64xf32, #tpu.memory_space<vmem>>, vector<2x8x64xf32>
    tpu.vector_store %arg13[%c0_69, %c0_70, %c0_71], %171 {strides = array<i32>} : memref<2x8x64xf32, #tpu.memory_space<vmem>>, vector<2x8x64xf32>,
    return
  }
  func.func @transform_0(%arg0: i32) -> (i32, i32, i32) {
    %c0_i32 = arith.constant 0 : i32
    %c0_i32_0 = arith.constant 0 : i32
    %c0_i32_1 = arith.constant 0 : i32
    return %arg0, %c0_i32, %c0_i32_0 : i32, i32, i32
  }
  func.func @transform_1(%arg0: i32) -> (i32, i32) {
    %c0_i32 = arith.constant 0 : i32
    %c0_i32_0 = arith.constant 0 : i32
    %c0_i32_1 = arith.constant 0 : i32
    return %c0_i32, %c0_i32_0 : i32, i32
  }
  func.func @transform_2(%arg0: i32) -> (i32, i32) {
    %c0_i32 = arith.constant 0 : i32
    %c0_i32_0 = arith.constant 0 : i32
    %c0_i32_1 = arith.constant 0 : i32
    return %c0_i32, %c0_i32_0 : i32, i32
  }
  func.func @transform_3(%arg0: i32) -> (i32, i32) {
    %c0_i32 = arith.constant 0 : i32
    %c0_i32_0 = arith.constant 0 : i32
    %c0_i32_1 = arith.constant 0 : i32
    return %c0_i32, %c0_i32_0 : i32, i32
  }
  func.func @transform_4(%arg0: i32) -> (i32, i32) {
    %c0_i32 = arith.constant 0 : i32
    %c0_i32_0 = arith.constant 0 : i32
    %c0_i32_1 = arith.constant 0 : i32
    return %c0_i32, %c0_i32_0 : i32, i32
  }
  func.func @transform_5(%arg0: i32) -> (i32, i32) {
    %c0_i32 = arith.constant 0 : i32
    %c0_i32_0 = arith.constant 0 : i32
    %c0_i32_1 = arith.constant 0 : i32
    return %c0_i32, %c0_i32_0 : i32, i32
  }
  func.func @transform_6(%arg0: i32) -> (i32, i32) {
    %c0_i32 = arith.constant 0 : i32
    %c0_i32_0 = arith.constant 0 : i32
    %c0_i32_1 = arith.constant 0 : i32
    return %c0_i32, %c0_i32_0 : i32, i32
  }
  func.func @transform_7(%arg0: i32) -> (i32, i32) {
    %c0_i32 = arith.constant 0 : i32
    %c0_i32_0 = arith.constant 0 : i32
    %c0_i32_1 = arith.constant 0 : i32
    return %c0_i32, %c0_i32_0 : i32, i32
  }
  func.func @transform_8(%arg0: i32) -> (i32, i32) {
    %c0_i32 = arith.constant 0 : i32
    %c0_i32_0 = arith.constant 0 : i32
    %c0_i32_1 = arith.constant 0 : i32
    return %c0_i32, %c0_i32_0 : i32, i32
  }
  func.func @transform_9(%arg0: i32) -> (i32, i32) {
    %c0_i32 = arith.constant 0 : i32
    %c0_i32_0 = arith.constant 0 : i32
    %c0_i32_1 = arith.constant 0 : i32
    return %c0_i32, %c0_i32_0 : i32, i32
  }
  func.func @transform_10(%arg0: i32) -> (i32, i32) {
    %c0_i32 = arith.constant 0 : i32
    %c0_i32_0 = arith.constant 0 : i32
    %c0_i32_1 = arith.constant 0 : i32
    return %c0_i32, %c0_i32_0 : i32, i32
  }
  func.func @transform_11(%arg0: i32) -> (i32, i32) {
    %c0_i32 = arith.constant 0 : i32
    %c0_i32_0 = arith.constant 0 : i32
    %c0_i32_1 = arith.constant 0 : i32
    return %c0_i32, %c0_i32_0 : i32, i32
  }
  func.func @transform_12(%arg0: i32) -> (i32, i32, i32) {
    %c0_i32 = arith.constant 0 : i32
    %c0_i32_0 = arith.constant 0 : i32
    %c0_i32_1 = arith.constant 0 : i32
    return %arg0, %c0_i32, %c0_i32_0 : i32, i32, i32
  }
}

</mosaic_0001>

<bundles_post_ra>
// kernel: tpu_custom_call.1
= control target key start
LH: loop header
LB: loop body
LE: loop exit
PB: predicated region body
PF: predicated region fallthrough
CT: control target
= control target key end

     0   :  { %vm44_vm0 = vcmask 523264   ;;  %s3052_s0 = inlined_call_operand.vmem [shape: f32[2,8,64], index: 0, kind: input, shape index: {}]   ;;  %s3053_s1 = inlined_call_operand.vmem [shape: f32[1,64], index: 1, kind: input, shape index: {}]   ;;  %s3054_s2 = inlined_call_operand.vmem [shape: f32[1,64], index: 2, kind: input, shape index: {}]   ;;  %s3055_s3 = inlined_call_operand.vmem [shape: f32[64,192], index: 3, kind: input, shape index: {}]   ;;  %s3056_s4 = inlined_call_operand.vmem [shape: f32[64,64], index: 4, kind: input, shape index: {}]   ;;  %s3057_s5 = inlined_call_operand.vmem [shape: f32[1,64], index: 5, kind: input, shape index: {}]   ;;  %s3058_s6 = inlined_call_operand.vmem [shape: f32[1,64], index: 6, kind: input, shape index: {}]   ;;  %s3059_s7 = inlined_call_operand.vmem [shape: f32[1,64], index: 7, kind: input, shape index: {}]   ;;  %s3060_s8 = inlined_call_operand.vmem [shape: f32[64,256], index: 8, kind: input, shape index: {}]   ;;  %s3061_s9 = inlined_call_operand.vmem [shape: f32[1,256], index: 9, kind: input, shape index: {}]   ;;  %s3062_s10 = inlined_call_operand.vmem [shape: f32[256,64], index: 10, kind: input, shape index: {}]   ;;  %s3063_s11 = inlined_call_operand.vmem [shape: f32[1,64], index: 11, kind: input, shape index: {}]   ;;  %s3064_s12 = inlined_call_operand.hbm [shape: f32[2,8,64], index: 12, kind: output, shape index: {}]  }
   0x1   :  { %v2574_v0 = vld [vmem:[%s3052_s0] sm:$0xff]  ;;  %v2579_v1 = vld [vmem:[%s3052_s0 + $0x8] sm:$0xff] }
   0x2   :  { %17 = vsyncpa [#allocation3], 0  ;;  %v45_v2 = vsel %vm44_vm0, %v2574_v0, 0.0  ;;  %v48_v3 = vsel %vm44_vm0, %v2579_v1, 0.0  ;;  %v105_v14 = vld [vmem:[%s3055_s3 + $0x78] sm:$0xff]  ;;  %v104_v15 = vld [vmem:[%s3055_s3 + $0x70] sm:$0xff]  ;;  %v189_v52 = vlaneseq }
   0x3   :  { %46 = vadd.xlane.f32.xlu0 %v45_v2  ;;  %128 = vmatprep.subr.mxu0 %v105_v14  ;;  %v103_v16 = vld [vmem:[%s3055_s3 + $0x68] sm:$0xff]  ;;  %v102_v17 = vld [vmem:[%s3055_s3 + $0x60] sm:$0xff]  ;;  %v101_v18 = vld [vmem:[%s3055_s3 + $0x58] sm:$0xff]  ;;  %v2494_v30 = vmov 0.0   ;;  %vm2495_vm1 = vmmov 0   ;;  %vm197_vm2 = vcmask 130048  }
   0x4   :  { %2404 = vmatprep.subr.mxu1 %v105_v14  ;;  %129 = vmatpush1.msra.mxu0 %v104_v15  ;;  %v100_v19 = vld [vmem:[%s3055_s3 + $0x50] sm:$0xff]  ;;  %v99_v20 = vld [vmem:[%s3055_s3 + $0x48] sm:$0xff]  ;;  %v98_v21 = vld [vmem:[%s3055_s3 + $0x40] sm:$0xff]  ;;  %v2685_v53 = vshrl.u32 %v189_v52, 7  ;;  %v192_v54 = vand.u32 127, %v189_v52  ;;  %vm355_vm4 = vcmask 64512  }
   0x5   :  { %2412 = vmatpush1.msra.mxu1 %v104_v15  ;;  %130 = vmatprep.subr.mxu0 %v103_v16  ;;  %v97_v22 = vld [vmem:[%s3055_s3 + $0x38] sm:$0xff]  ;;  %v96_v23 = vld [vmem:[%s3055_s3 + $0x30] sm:$0xff]  ;;  %v95_v24 = vld [vmem:[%s3055_s3 + $0x28] sm:$0xff]  ;;  %s2498_s22 = smov 112   ;;  %s2499_s23 = smov 32  }
   0x6   :  { %2405 = vmatprep.subr.mxu1 %v103_v16  ;;  %131 = vmatpush1.msra.mxu0 %v102_v17  ;;  %v94_v25 = vld [vmem:[%s3055_s3 + $0x20] sm:$0xff]  ;;  %v93_v26 = vld [vmem:[%s3055_s3 + $0x18] sm:$0xff]  ;;  %v92_v27 = vld [vmem:[%s3055_s3 + $0x10] sm:$0xff]  ;;  %vm2690_vm3 = vcmp.le.s32.totalorder %v192_v54, %v2685_v53  ;;  %s2500_s24 = smov 96   ;;  %s2501_s14 = smov 16  }
   0x7   :  { %49 = vadd.xlane.f32.xlu0 %v48_v3  ;;  %2413 = vmatpush1.msra.mxu1 %v102_v17  ;;  %v91_v28 = vld [vmem:[%s3055_s3 + $0x8] sm:$0xff]  ;;  %v90_v29 = vld [vmem:[%s3055_s3] sm:$0xff]  ;;  %s2502_s15 = smov 80  }
   0x8   :  { %132 = vmatprep.subr.mxu0 %v101_v18  ;;  %2406 = vmatprep.subr.mxu1 %v101_v18  ;;  %v2168_v38 = vld [vmem:[%s3053_s1] ss:$0 sm:$0xff]  ;;  %s2496_s1 = smov 64   ;;  %v525_v52 = vld [vmem:[%s3056_s4 + $0x8] sm:$0xff] }
   0x9   :  { %133 = vmatpush1.msra.mxu0 %v100_v19  ;;  %2414 = vmatpush1.msra.mxu1 %v100_v19  ;;  %v2169_v40 = vld [vmem:[%s3054_s2] ss:$0 sm:$0xff]  ;;  %s2497_s2 = smov 48  }
   0xa   :  { %134 = vmatprep.subr.mxu0 %v99_v20  ;;  %2407 = vmatprep.subr.mxu1 %v99_v20 }
   0xb   :  { %135 = vmatpush1.msra.mxu0 %v98_v21  ;;  %2415 = vmatpush1.msra.mxu1 %v98_v21 }
   0xc   :  { %136 = vmatprep.subr.mxu0 %v97_v22  ;;  %2408 = vmatprep.subr.mxu1 %v97_v22 }
   0xd   :  { %137 = vmatpush1.msra.mxu0 %v96_v23  ;;  %2416 = vmatpush1.msra.mxu1 %v96_v23 }
   0xe   :  { %138 = vmatprep.subr.mxu0 %v95_v24  ;;  %2409 = vmatprep.subr.mxu1 %v95_v24 }
   0xf   :  { %139 = vmatpush1.msra.mxu0 %v94_v25  ;;  %2417 = vmatpush1.msra.mxu1 %v94_v25 }
  0x10   :  { %140 = vmatprep.subr.mxu0 %v93_v26  ;;  %176 = vmatprep.mubr.f32.mxu0 %v2494_v30 }
  0x11   :  { %141 = vmatpush1.msra.mxu0 %v92_v27  ;;  %2410 = vmatprep.subr.mxu1 %v93_v26 }
  0x12   :  { %142 = vmatprep.subr.mxu0 %v91_v28  ;;  %2418 = vmatpush1.msra.mxu1 %v92_v27 }
  0x13   :  { %143 = vmatpush1.msra.mxu0 %v90_v29  ;;  %2411 = vmatprep.subr.mxu1 %v91_v28 }
  0x14   :  { %2419 = vmatpush1.msra.mxu1 %v90_v29  ;;  %182 = vmatprep.mubr.f32.mxu1 %v2494_v30 }
  0x15   :  { %2296 = vmatprep.subr.mxu1 %v2494_v30  ;;  %2321 = vmatprep.subr.mxu0 %v2494_v30 }
  0x8c   :  { %v47_v4 = vpop.xlane.xlu0 %46 }
  0x8d   :  { %v52_v5 = vmul.f32 0.015625, %v47_v4 }
  0x8f   :  { %v2586_v6 = vsub.f32 %v2574_v0, %v52_v5 }
  0x90   :  { %v50_v7 = vpop.xlane.xlu0 %49 }
  0x91   :  { %v53_v8 = vmul.f32 0.015625, %v50_v7  ;;  %v56_v9 = vmul.f32 %v2586_v6, %v2586_v6 }
  0x93   :  { %v2591_v10 = vsub.f32 %v2579_v1, %v53_v8  ;;  %v58_v11 = vsel %vm44_vm0, %v56_v9, 0.0 }
  0x94   :  { %59 = vadd.xlane.f32.xlu1 %v58_v11 }
  0x95   :  { %v57_v12 = vmul.f32 %v2591_v10, %v2591_v10 }
  0x97   :  { %v61_v13 = vsel %vm44_vm0, %v57_v12, 0.0 }
  0x98   :  { %62 = vadd.xlane.f32.xlu1 %v61_v13 }
 0x11d   :  { %v60_v31 = vpop.xlane.xlu1 %59 }
 0x11e   :  { %v64_v32 = vmul.f32 0.015625, %v60_v31 }
 0x120   :  { %v66_v33 = vadd.f32 1e-05, %v64_v32 }
 0x121   :  { %v63_v34 = vpop.xlane.xlu1 %62 }
 0x122   :  { %2432 = vrsqrt.f32 %v66_v33  ;;  %v65_v35 = vmul.f32 0.015625, %v63_v34 }
 0x124   :  { %v67_v36 = vadd.f32 1e-05, %v65_v35 }
 0x126   :  { %2434 = vrsqrt.f32 %v67_v36 }
 0x12f   :  { %v2433_v37 = vpop.eup %2432 }
 0x130   :  { %v70_v39 = vmul.f32 %v2433_v37, %v2586_v6 }
 0x132   :  { %v79_v41 = vmul.f32 %v2168_v38, %v70_v39 }
 0x133   :  { %v2435_v42 = vpop.eup %2434 }
 0x134   :  { %v88_v43 = vadd.f32 %v2169_v40, %v79_v41  ;;  %v71_v44 = vmul.f32 %v2435_v42, %v2591_v10 }
 0x136   :  { %2170 = vmatmul.mubr.msk.f32.vlgmr.msra.gmra.mxu0 %vm44_vm0, %v88_v43  ;;  %v80_v45 = vmul.f32 %v2168_v38, %v71_v44 }
 0x137   :  { %2323 = vmatprep.mubr.msk.f32.mxu0 %vm2495_vm1, %v2494_v30 }
 0x138   :  { %v89_v46 = vadd.f32 %v2169_v40, %v80_v45 }
 0x13a   :  { %2171 = vmatmul.mubr.msk.f32.vlgmr.msra.gmra.mxu1 %vm44_vm0, %v89_v46 }
 0x13b   :  { %2298 = vmatprep.mubr.msk.f32.mxu1 %vm2495_vm1, %v2494_v30 }
 0x1f6   :  { %v2663_v47 = vpop.f32.mrf.mxu0 }
 0x1f7   :  { %195 = vrot.lane.b32.xlu0 %v2663_v47, %s2496_s1 }
 0x1f8   :  { %v2677_v51 = vpop.f32.mrf.mxu0 }
 0x1fa   :  { %v2666_v48 = vpop.f32.mrf.mxu1 }
 0x1fb   :  { %273 = vrot.lane.b32.xlu1 %v2666_v48, %s2496_s1 }
 0x1fc   :  { %v2687_v55 = vpop.f32.mrf.mxu1 }
 0x269   :  { %v196_v49 = vpop.permute.xlu0 %195 }
 0x26a   :  { %2297 = vmatpush3.xpose.msk.msra.mxu1 %vm197_vm2, %v196_v49 }
 0x26b   :  { %2301 = vmatprep.subr.mxu1 %v2494_v30 }
 0x26d   :  { %v274_v50 = vpop.permute.xlu1 %273  ;;  %2299 = vmatmul.mubr.msk.f32.vlgmr.msra.gmra.mxu1 %vm197_vm2, %v2663_v47 }
 0x26e   :  { %2302 = vmatpush3.xpose.msk.msra.mxu1 %vm197_vm2, %v274_v50  ;;  %2303 = vmatprep.mubr.msk.f32.mxu1 %vm2495_vm1, %v2494_v30 }
 0x26f   :  { %2306 = vmatprep.subr.mxu1 %v2494_v30 }
 0x271   :  { %2304 = vmatmul.mubr.msk.f32.vlgmr.msra.gmra.mxu1 %vm197_vm2, %v2666_v48 }
 0x272   :  { %2307 = vmatpush3.msra.mxu1 %v2677_v51  ;;  %2308 = vmatprep.mubr.msk.f32.mxu1 %vm2495_vm1, %v2494_v30 }
 0x273   :  { %2311 = vmatprep.subr.mxu1 %v2494_v30 }
 0x32d   :  { %v268_v56 = vpop.f32.mrf.mxu1 }
 0x32e   :  { %v349_v58 = vmul.f32 0.125, %v268_v56 }
 0x32f   :  { %v2300_v59 = vpop.f32.mrf.mxu1 }
 0x330   :  { %v353_v60 = vsel %vm2690_vm3, %v349_v58, -inf }
 0x331   :  { %v345_v61 = vpop.f32.mrf.mxu1  ;;  %v356_v62 = vsel %vm355_vm4, %v353_v60, -inf }
 0x332   :  { %v350_v63 = vmul.f32 0.125, %v345_v61  ;;  %357 = vmax.xlane.f32.xlu1 %v356_v62 }
 0x333   :  { %v2305_v2 = vpop.f32.mrf.mxu1 }
 0x334   :  { %v354_v3 = vsel %vm2690_vm3, %v350_v63, -inf  ;;  %v524_v63 = vld [vmem:[%s3056_s4] sm:$0xff] }
 0x335   :  { %v359_v4 = vsel %vm355_vm4, %v354_v3, -inf }
 0x336   :  { %360 = vmax.xlane.f32.xlu0 %v359_v4 }
 0x343   :  { %606 = vrot.lane.b32.xlu1 %v2666_v48, %s2497_s2 }
 0x347   :  { %526 = vrot.lane.b32.xlu1 %v2663_v47, %s2498_s22 }
 0x3bb   :  { %v358_v5 = vpop.xlane.xlu1 %357 }
 0x3bc   :  { %v362_v6 = vsub.f32 %v353_v60, %v358_v5 }
 0x3be   :  { %v364_v7 = vmul.f32 1.442695, %v362_v6 }
 0x3bf   :  { %v607_v8 = vpop.permute.xlu1 %606  ;;  %v361_v9 = vpop.xlane.xlu0 %360 }
 0x3c0   :  { %2436 = vpow2.f32 %v364_v7  ;;  %v363_v10 = vsub.f32 %v354_v3, %v361_v9  ;;  %2322 = vmatpush3.xpose.msk.msra.mxu0 %vm197_vm2, %v607_v8  ;;  %v863_v7 = vld [vmem:[%s3056_s4 + $0x18] sm:$0xff]  ;;  %v862_v8 = vld [vmem:[%s3056_s4 + $0x10] sm:$0xff] }
 0x3c1   :  { %2331 = vmatprep.subr.mxu0 %v2494_v30 }
 0x3c2   :  { %v366_v11 = vmul.f32 1.442695, %v363_v10 }
 0x3c3   :  { %v527_v16 = vpop.permute.xlu1 %526 }
 0x3c4   :  { %2438 = vpow2.f32 %v366_v11 }
 0x3cd   :  { %v2437_v12 = vpop.eup %2436 }
 0x3ce   :  { %v368_v13 = vsel %vm355_vm4, %v2437_v12, 0.0 }
 0x3cf   :  { %369 = vadd.xlane.f32.xlu0 %v368_v13 }
 0x3d1   :  { %v2439_v14 = vpop.eup %2438 }
 0x3d2   :  { %v371_v15 = vsel %vm355_vm4, %v2439_v14, 0.0 }
 0x3d3   :  { %372 = vadd.xlane.f32.xlu1 %v371_v15 }
 0x3e4   :  { %604 = vrot.lane.b32.xlu1 %v2666_v48, %s2498_s22 }
 0x3e5   :  { %528 = vrot.lane.b32.xlu0 %v2663_v47, %s2497_s2 }
 0x458   :  { %v370_v17 = vpop.xlane.xlu0 %369 }
 0x459   :  { %2440 = vrcp.f32 %v370_v17 }
 0x45c   :  { %v373_v18 = vpop.xlane.xlu1 %372  ;;  %v529_v24 = vpop.permute.xlu0 %528 }
 0x45d   :  { %2442 = vrcp.f32 %v373_v18 }
 0x460   :  { %v605_v19 = vpop.permute.xlu1 %604 }
 0x461   :  { %2324 = vmatmul.mubr.msk.f32.vlgmr.msra.gmra.mxu0 %vm197_vm2, %v605_v19 }
 0x462   :  { %2333 = vmatprep.mubr.msk.f32.mxu0 %vm2495_vm1, %v2494_v30 }
 0x466   :  { %v2441_v20 = vpop.eup %2440 }
 0x467   :  { %v376_v21 = vmul.f32 %v2441_v20, %v2437_v12 }
 0x469   :  { %2309 = vmatmul.mubr.msk.f32.vlgmr.msra.gmra.mxu1 %vm355_vm4, %v376_v21 }
 0x46a   :  { %v2443_v22 = vpop.eup %2442  ;;  %2312 = vmatpush3.msra.mxu1 %v2687_v55  ;;  %2313 = vmatprep.mubr.msk.f32.mxu1 %vm2495_vm1, %v2494_v30 }
 0x46b   :  { %2316 = vmatprep.subr.mxu1 %v2494_v30  ;;  %v377_v23 = vmul.f32 %v2443_v22, %v2439_v14 }
 0x46d   :  { %2314 = vmatmul.mubr.msk.f32.vlgmr.msra.gmra.mxu1 %vm355_vm4, %v377_v23 }
 0x46e   :  { %2317 = vmatpush3.xpose.msk.msra.mxu1 %vm197_vm2, %v529_v24  ;;  %2318 = vmatprep.mubr.msk.f32.mxu1 %vm2495_vm1, %v2494_v30 }
 0x46f   :  { %2326 = vmatprep.subr.mxu1 %v2494_v30 }
 0x471   :  { %2319 = vmatmul.mubr.msk.f32.vlgmr.msra.gmra.mxu1 %vm197_vm2, %v527_v16 }
 0x472   :  { %2328 = vmatprep.mubr.msk.f32.mxu1 %vm2495_vm1, %v2494_v30 }
 0x521   :  { %v678_v25 = vpop.f32.mrf.mxu0 }
 0x522   :  { %v683_v26 = vmul.f32 0.125, %v678_v25 }
 0x523   :  { %v2325_v27 = vpop.f32.mrf.mxu0 }
 0x524   :  { %v685_v28 = vsel %vm2690_vm3, %v683_v26, -inf }
 0x525   :  { %v689_v29 = vsel %vm355_vm4, %v685_v28, -inf }
 0x526   :  { %690 = vmax.xlane.f32.xlu1 %v689_v29 }
 0x529   :  { %v447_v31 = vpop.f32.mrf.mxu1 }
 0x52b   :  { %v2310_v32 = vpop.f32.mrf.mxu1 }
 0x52d   :  { %v520_v33 = vpop.f32.mrf.mxu1 }
 0x52f   :  { %v2315_v34 = vpop.f32.mrf.mxu1 }
 0x531   :  { %v600_v35 = vpop.f32.mrf.mxu1 }
 0x532   :  { %v682_v36 = vmul.f32 0.125, %v600_v35 }
 0x533   :  { %v2320_v37 = vpop.f32.mrf.mxu1 }
 0x534   :  { %v684_v38 = vsel %vm2690_vm3, %v682_v36, -inf }
 0x535   :  { %v686_v39 = vsel %vm355_vm4, %v684_v38, -inf }
 0x536   :  { %687 = vmax.xlane.f32.xlu0 %v686_v39 }
 0x537   :  { %786 = vrot.lane.b32.xlu1 %v2687_v55, %s2498_s22 }
 0x53b   :  { %1028 = vrot.lane.b32.xlu1 %v2663_v47, %s2499_s23 }
 0x53f   :  { %1106 = vrot.lane.b32.xlu1 %v2666_v48, %s2499_s23 }
 0x543   :  { %1104 = vrot.lane.b32.xlu1 %v2666_v48, %s2500_s24 }
 0x5af   :  { %v691_v40 = vpop.xlane.xlu1 %690 }
 0x5b0   :  { %v693_v41 = vsub.f32 %v685_v28, %v691_v40 }
 0x5b2   :  { %v696_v42 = vmul.f32 1.442695, %v693_v41 }
 0x5b3   :  { %v787_v43 = vpop.permute.xlu1 %786 }
 0x5b4   :  { %2444 = vpow2.f32 %v696_v42  ;;  %2332 = vmatpush3.msra.mxu0 %v787_v43 }
 0x5b5   :  { %2343 = vmatprep.subr.mxu0 %v525_v52 }
 0x5b7   :  { %v1029_v59 = vpop.permute.xlu1 %1028 }
 0x5bb   :  { %v1107_v2 = vpop.permute.xlu1 %1106 }
 0x5bf   :  { %v688_v44 = vpop.xlane.xlu0 %687  ;;  %v1105_v4 = vpop.permute.xlu1 %1104 }
 0x5c0   :  { %v692_v45 = vsub.f32 %v684_v38, %v688_v44 }
 0x5c1   :  { %v2445_v46 = vpop.eup %2444 }
 0x5c2   :  { %v694_v49 = vmul.f32 1.442695, %v692_v45  ;;  %v701_v50 = vsel %vm355_vm4, %v2445_v46, 0.0 }
 0x5c3   :  { %702 = vadd.xlane.f32.xlu0 %v701_v50 }
 0x5c4   :  { %2446 = vpow2.f32 %v694_v49 }
 0x5d1   :  { %v2447_v54 = vpop.eup %2446 }
 0x5d2   :  { %v698_v56 = vsel %vm355_vm4, %v2447_v54, 0.0 }
 0x5d3   :  { %699 = vadd.xlane.f32.xlu0 %v698_v56 }
 0x5e9   :  { %709 = vrot.lane.b32.xlu0 %v2677_v51, %s2498_s22 }
 0x5ed   :  { %1026 = vrot.lane.b32.xlu0 %v2663_v47, %s2500_s24 }
 0x64c   :  { %v703_v58 = vpop.xlane.xlu0 %702 }
 0x64d   :  { %2448 = vrcp.f32 %v703_v58 }
 0x65a   :  { %v2449_v60 = vpop.eup %2448 }
 0x65b   :  { %v707_v61 = vmul.f32 %v2449_v60, %v2445_v46 }
 0x65c   :  { %v700_v62 = vpop.xlane.xlu0 %699 }
 0x65d   :  { %2450 = vrcp.f32 %v700_v62  ;;  %2334 = vmatmul.mubr.msk.f32.vlgmr.msra.gmra.mxu0 %vm355_vm4, %v707_v61 }
 0x65e   :  { %2344 = vmatpush3.msra.mxu0 %v525_v52  ;;  %2347 = vmatprep.mubr.msk.f32.mxu0 %vm197_vm2, %v447_v31 }
 0x65f   :  { %2345 = vmatprep.subr.mxu0 %v524_v63 }
 0x660   :  { %2346 = vmatpush3.msra.mxu0 %v524_v63  ;;  %v710_v3 = vpop.permute.xlu0 %709 }
 0x661   :  { %2355 = vmatprep.subr.mxu0 %v2494_v30  ;;  %2327 = vmatpush3.msra.mxu1 %v710_v3 }
 0x662   :  { %2348 = vmatmul.mubr.msk.f32.vlgmr.msra.gmra.mxu0 %vm197_vm2, %v520_v33  ;;  %2336 = vmatprep.subr.mxu1 %v863_v7 }
 0x663   :  { %2356 = vmatpush3.xpose.msk.msra.mxu0 %vm197_vm2, %v1107_v2  ;;  %2357 = vmatprep.mubr.msk.f32.mxu0 %vm2495_vm1, %v2494_v30 }
 0x664   :  { %2365 = vmatprep.subr.mxu0 %v2494_v30  ;;  %v1027_v20 = vpop.permute.xlu0 %1026 }
 0x666   :  { %2358 = vmatmul.mubr.msk.f32.vlgmr.msra.gmra.mxu0 %vm197_vm2, %v1105_v4 }
 0x667   :  { %2367 = vmatprep.mubr.msk.f32.mxu0 %vm2495_vm1, %v2494_v30 }
 0x66a   :  { %v2451_v5 = vpop.eup %2450 }
 0x66b   :  { %v706_v6 = vmul.f32 %v2451_v5, %v2447_v54  ;;  %v1360_v54 = vld [vmem:[%s3056_s4 + $0x20] sm:$0xff] }
 0x66d   :  { %2329 = vmatmul.mubr.msk.f32.vlgmr.msra.gmra.mxu1 %vm355_vm4, %v706_v6 }
 0x66e   :  { %2337 = vmatpush3.msra.mxu1 %v863_v7 }
 0x66f   :  { %2338 = vmatprep.subr.mxu1 %v862_v8 }
 0x670   :  { %2339 = vmatpush3.msra.mxu1 %v862_v8 }
 0x671   :  { %2350 = vmatprep.subr.mxu1 %v2494_v30 }
 0x71d   :  { %v858_v9 = vpop.f32.mrf.mxu0 }
 0x71f   :  { %v2335_v10 = vpop.f32.mrf.mxu0 }
 0x722   :  { %v2769_v11 = vpop.f32.mrf.mxu0 }
 0x724   :  { %v2771_v12 = vpop.f32.mrf.mxu0 }
 0x726   :  { %v1178_v13 = vpop.f32.mrf.mxu0 }
 0x727   :  { %v1183_v14 = vmul.f32 0.125, %v1178_v13 }
 0x728   :  { %v2359_v15 = vpop.f32.mrf.mxu0 }
 0x729   :  { %v1185_v16 = vsel %vm2690_vm3, %v1183_v14, -inf }
 0x72a   :  { %v1189_v17 = vsel %vm355_vm4, %v1185_v16, -inf }
 0x72b   :  { %1190 = vmax.xlane.f32.xlu1 %v1189_v17 }
 0x72d   :  { %v781_v18 = vpop.f32.mrf.mxu1 }
 0x72e   :  { %2340 = vmatprep.mubr.msk.f32.mxu1 %vm197_vm2, %v781_v18 }
 0x72f   :  { %v2330_v19 = vpop.f32.mrf.mxu1  ;;  %2341 = vmatmul.mubr.msk.f32.vlgmr.msra.gmra.mxu1 %vm197_vm2, %v858_v9 }
 0x730   :  { %2351 = vmatpush3.xpose.msk.msra.mxu1 %vm197_vm2, %v1029_v59  ;;  %2352 = vmatprep.mubr.msk.f32.mxu1 %vm2495_vm1, %v2494_v30 }
 0x731   :  { %2360 = vmatprep.subr.mxu1 %v2494_v30 }
 0x733   :  { %2353 = vmatmul.mubr.msk.f32.vlgmr.msra.gmra.mxu1 %vm197_vm2, %v1027_v20 }
 0x734   :  { %2362 = vmatprep.mubr.msk.f32.mxu1 %vm2495_vm1, %v2494_v30 }
 0x73c   :  { %1284 = vrot.lane.b32.xlu1 %v2687_v55, %s2500_s24 }
 0x740   :  { %1447 = vrot.lane.b32.xlu1 %v2663_v47, %s2501_s14 }
 0x744   :  { %1525 = vrot.lane.b32.xlu1 %v2666_v48, %s2501_s14 }
 0x748   :  { %1523 = vrot.lane.b32.xlu1 %v2666_v48, %s2502_s15 }
 0x7b4   :  { %v1191_v21 = vpop.xlane.xlu1 %1190 }
 0x7b5   :  { %v1193_v23 = vsub.f32 %v1185_v16, %v1191_v21 }
 0x7b7   :  { %v1196_v24 = vmul.f32 1.442695, %v1193_v23 }
 0x7b8   :  { %v1285_v22 = vpop.permute.xlu1 %1284 }
 0x7b9   :  { %2366 = vmatpush3.msra.mxu0 %v1285_v22  ;;  %2452 = vpow2.f32 %v1196_v24 }
 0x7ba   :  { %2377 = vmatprep.subr.mxu0 %v2494_v30 }
 0x7bc   :  { %v1448_v42 = vpop.permute.xlu1 %1447 }
 0x7c0   :  { %v1526_v62 = vpop.permute.xlu1 %1525 }
 0x7c4   :  { %v1524_v3 = vpop.permute.xlu1 %1523 }
 0x7c6   :  { %v2453_v32 = vpop.eup %2452 }
 0x7c7   :  { %v1201_v33 = vsel %vm355_vm4, %v2453_v32, 0.0 }
 0x7ef   :  { %v2792_v25 = vpop.f32.mrf.mxu1 }
 0x7f0   :  { %v1023_v9 = vadd.f32 %v2769_v11, %v2792_v25 }
 0x7f1   :  { %v2794_v26 = vpop.f32.mrf.mxu1 }
 0x7f2   :  { %v1018_v13 = vadd.f32 %v2771_v12, %v2794_v26 }
 0x7f3   :  { %v1100_v27 = vpop.f32.mrf.mxu1 }
 0x7f4   :  { %v1182_v28 = vmul.f32 0.125, %v1100_v27 }
 0x7f5   :  { %v2354_v29 = vpop.f32.mrf.mxu1 }
 0x7f6   :  { %v1184_v31 = vsel %vm2690_vm3, %v1182_v28, -inf }
 0x7f7   :  { %v1186_v48 = vsel %vm355_vm4, %v1184_v31, -inf }
 0x7f8   :  { %1187 = vmax.xlane.f32.xlu0 %v1186_v48  ;;  %v1779_v48 = vld [vmem:[%s3056_s4 + $0x30] sm:$0xff] }
 0x7fc   :  { %1202 = vadd.xlane.f32.xlu0 %v1201_v33 }
 0x881   :  { %v1188_v34 = vpop.xlane.xlu0 %1187 }
 0x882   :  { %v1192_v35 = vsub.f32 %v1184_v31, %v1188_v34 }
 0x884   :  { %v1194_v36 = vmul.f32 1.442695, %v1192_v35 }
 0x885   :  { %v1203_v37 = vpop.xlane.xlu0 %1202 }
 0x886   :  { %2454 = vpow2.f32 %v1194_v36 }
 0x887   :  { %2456 = vrcp.f32 %v1203_v37  ;;  %v2204_v37 = vld [vmem:[%s3057_s5] ss:$0 sm:$0xff]  ;;  %s2503_s5 = smov [#allocation2]  }
 0x888   :  { %s2157_s23 = sshll.u32 %s2503_s5, 4  ;;  %s2158_s23 = int_to_ptr.vmem [resolvable:$true] %s2157_s23 }
 0x889   :  { %p2477_p1 = scmp.lt.s32.totalorder %s2158_s23, %s2158_s23 }
 0x893   :  { %v2455_v38 = vpop.eup %2454 }
 0x894   :  { %v2457_v39 = vpop.eup %2456  ;;  %v1198_v40 = vsel %vm355_vm4, %v2455_v38, 0.0 }
 0x895   :  { %1199 = vadd.xlane.f32.xlu0 %v1198_v40  ;;  %v1207_v41 = vmul.f32 %v2457_v39, %v2453_v32 }
 0x897   :  { %2368 = vmatmul.mubr.msk.f32.vlgmr.msra.gmra.mxu0 %vm355_vm4, %v1207_v41 }
 0x898   :  { %2378 = vmatpush3.xpose.msk.msra.mxu0 %vm197_vm2, %v1448_v42  ;;  %2379 = vmatprep.mubr.msk.f32.mxu0 %vm2495_vm1, %v2494_v30 }
 0x899   :  { %2387 = vmatprep.subr.mxu0 %v2494_v30 }
 0x8ab   :  { %1208 = vrot.lane.b32.xlu0 %v2677_v51, %s2500_s24  ;;  %s2472_s24 = scalar_lea.vmem %s2158_s23, 256 }
 0x8ac   :  { %p2473_p0 = scmp.ne.s32.totalorder %s2158_s23, %s2472_s24  ;;  %p2478_p2 = scmp.lt.s32.totalorder %s2472_s24, %s2472_s24 }
 0x8ae   :  { %p2479_p3 = por %p2478_p2, %p2477_p1 }
 0x8af   :  { %1445 = vrot.lane.b32.xlu0 %v2663_v47, %s2502_s15  ;;  %v1361_v47 = vld [vmem:[%s3056_s4 + $0x28] sm:$0xff] }
 0x8b0   :  { %p2480_p4 = pnand %p2479_p3, %p2473_p0 }
 0x91e   :  { %v1200_v43 = vpop.xlane.xlu0 %1199 }
 0x91f   :  { %2458 = vrcp.f32 %v1200_v43 }
 0x922   :  { %v1209_v44 = vpop.permute.xlu0 %1208 }
 0x923   :  { %2361 = vmatpush3.msra.mxu1 %v1209_v44 }
 0x924   :  { %2370 = vmatprep.subr.mxu1 %v1361_v47 }
 0x926   :  { %v1446_v45 = vpop.permute.xlu0 %1445 }
 0x927   :  { %2380 = vmatmul.mubr.msk.f32.vlgmr.msra.gmra.mxu0 %vm197_vm2, %v1446_v45 }
 0x928   :  { %2389 = vmatprep.mubr.msk.f32.mxu0 %vm2495_vm1, %v2494_v30 }
 0x92c   :  { %v2459_v46 = vpop.eup %2458 }
 0x92d   :  { %v1206_v49 = vmul.f32 %v2459_v46, %v2455_v38 }
 0x92f   :  { %2363 = vmatmul.mubr.msk.f32.vlgmr.msra.gmra.mxu1 %vm355_vm4, %v1206_v49 }
 0x930   :  { %2371 = vmatpush3.msra.mxu1 %v1361_v47 }
 0x931   :  { %2372 = vmatprep.subr.mxu1 %v1360_v54 }
 0x932   :  { %2373 = vmatpush3.msra.mxu1 %v1360_v54 }
 0x933   :  { %2382 = vmatprep.subr.mxu1 %v2494_v30 }
 0x957   :  { %v1356_v50 = vpop.f32.mrf.mxu0 }
 0x959   :  { %v2369_v52 = vpop.f32.mrf.mxu0 }
 0x9e7   :  { %v1519_v56 = vpop.f32.mrf.mxu0 }
 0x9e8   :  { %v1601_v58 = vmul.f32 0.125, %v1519_v56 }
 0x9e9   :  { %v2381_v59 = vpop.f32.mrf.mxu0 }
 0x9ea   :  { %v1603_v60 = vsel %vm2690_vm3, %v1601_v58, -inf }
 0x9eb   :  { %v1605_v61 = vsel %vm355_vm4, %v1603_v60, -inf }
 0x9ec   :  { %1606 = vmax.xlane.f32.xlu0 %v1605_v61  ;;  %v1933_v61 = vld [vmem:[%s3060_s8 + $0x70] sm:$0xff] }
 0x9ef   :  { %v1280_v63 = vpop.f32.mrf.mxu1 }
 0x9f0   :  { %2374 = vmatprep.mubr.msk.f32.mxu1 %vm197_vm2, %v1280_v63  ;;  %v1931_v63 = vld [vmem:[%s3060_s8 + $0x60] sm:$0xff] }
 0x9f1   :  { %v2364_v2 = vpop.f32.mrf.mxu1  ;;  %2375 = vmatmul.mubr.msk.f32.vlgmr.msra.gmra.mxu1 %vm197_vm2, %v1356_v50 }
 0x9f2   :  { %2383 = vmatpush3.xpose.msk.msra.mxu1 %vm197_vm2, %v1526_v62  ;;  %2384 = vmatprep.mubr.msk.f32.mxu1 %vm2495_vm1, %v2494_v30  ;;  %v1932_v62 = vld [vmem:[%s3060_s8 + $0x68] sm:$0xff]  ;;  %v1930_v2 = vld [vmem:[%s3060_s8 + $0x58] sm:$0xff] }
 0x9f3   :  { %2392 = vmatprep.subr.mxu1 %v2494_v30 }
 0x9f5   :  { %2385 = vmatmul.mubr.msk.f32.vlgmr.msra.gmra.mxu1 %vm197_vm2, %v1524_v3  ;;  %v1929_v3 = vld [vmem:[%s3060_s8 + $0x50] sm:$0xff] }
 0x9f6   :  { %2394 = vmatprep.mubr.msk.f32.mxu1 %vm2495_vm1, %v2494_v30 }
 0xa75   :  { %v1607_v4 = vpop.xlane.xlu0 %1606 }
 0xa76   :  { %v1611_v5 = vsub.f32 %v1603_v60, %v1607_v4  ;;  %v1934_v60 = vld [vmem:[%s3060_s8 + $0x78] sm:$0xff]  ;;  %v1928_v4 = vld [vmem:[%s3060_s8 + $0x48] sm:$0xff] }
 0xa78   :  { %v1613_v6 = vmul.f32 1.442695, %v1611_v5  ;;  %v1927_v5 = vld [vmem:[%s3060_s8 + $0x40] sm:$0xff] }
 0xa7a   :  { %2460 = vpow2.f32 %v1613_v6  ;;  %v1926_v6 = vld [vmem:[%s3060_s8 + $0x38] sm:$0xff] }
 0xa87   :  { %v2461_v7 = vpop.eup %2460 }
 0xa88   :  { %v1617_v8 = vsel %vm355_vm4, %v2461_v7, 0.0 }
 0xa89   :  { %1618 = vadd.xlane.f32.xlu0 %v1617_v8  ;;  %v1924_v8 = vld [vmem:[%s3060_s8 + $0x28] sm:$0xff] }
 0xab1   :  { %v2376_v10 = vpop.f32.mrf.mxu1 }
 0xab2   :  { %v1444_v14 = vadd.f32 %v2376_v10, %v1023_v9  ;;  %v1923_v9 = vld [vmem:[%s3060_s8 + $0x20] sm:$0xff]  ;;  %v1922_v10 = vld [vmem:[%s3060_s8 + $0x18] sm:$0xff] }
 0xab3   :  { %v1434_v15 = vpop.f32.mrf.mxu1 }
 0xab4   :  { %v1443_v16 = vadd.f32 %v1434_v15, %v1018_v13  ;;  %v1921_v13 = vld [vmem:[%s3060_s8 + $0x10] sm:$0xff]  ;;  %v1919_v15 = vld [vmem:[%s3060_s8] sm:$0xff] }
 0xab5   :  { %v1597_v17 = vpop.f32.mrf.mxu1 }
 0xab6   :  { %v1602_v18 = vmul.f32 0.125, %v1597_v17  ;;  %v2049_v17 = vld [vmem:[%s3062_s10 + $0x78] sm:$0xff] }
 0xab7   :  { %v2386_v19 = vpop.f32.mrf.mxu1 }
 0xab8   :  { %v1604_v20 = vsel %vm2690_vm3, %v1602_v18, -inf  ;;  %v2064_v18 = vld [vmem:[%s3062_s10 + $0xf0] sm:$0xff] }
 0xab9   :  { %v1608_v21 = vsel %vm355_vm4, %v1604_v20, -inf  ;;  %v2048_v19 = vld [vmem:[%s3062_s10 + $0x70] sm:$0xff] }
 0xaba   :  { %1609 = vmax.xlane.f32.xlu1 %v1608_v21  ;;  %v2047_v21 = vld [vmem:[%s3062_s10 + $0x68] sm:$0xff] }
 0xacb   :  { %1703 = vrot.lane.b32.xlu1 %v2687_v55, %s2502_s15 }
 0xb12   :  { %v1619_v57 = vpop.xlane.xlu0 %1618 }
 0xb43   :  { %v1610_v11 = vpop.xlane.xlu1 %1609 }
 0xb44   :  { %v1612_v22 = vsub.f32 %v1604_v20, %v1610_v11  ;;  %v2063_v20 = vld [vmem:[%s3062_s10 + $0xe8] sm:$0xff]  ;;  %v2062_v11 = vld [vmem:[%s3062_s10 + $0xe0] sm:$0xff] }
 0xb46   :  { %v1615_v23 = vmul.f32 1.442695, %v1612_v22  ;;  %v2046_v22 = vld [vmem:[%s3062_s10 + $0x60] sm:$0xff] }
 0xb47   :  { %v1704_v24 = vpop.permute.xlu1 %1703 }
 0xb48   :  { %2462 = vpow2.f32 %v1615_v23  ;;  %2393 = vmatpush3.msra.mxu1 %v1704_v24  ;;  %v2061_v23 = vld [vmem:[%s3062_s10 + $0xd8] sm:$0xff] }
 0xb49   :  { %2464 = vrcp.f32 %v1619_v57  ;;  %1969 = vmatprep.subr.mxu1 %v1934_v60  ;;  %v2045_v24 = vld [vmem:[%s3062_s10 + $0x58] sm:$0xff]  ;;  %v2059_v57 = vld [vmem:[%s3062_s10 + $0xc8] sm:$0xff] }
 0xb4a   :  { %v2035_v60 = vld [vmem:[%s3062_s10 + $0x8] sm:$0xff] }
 0xb55   :  { %v2463_v12 = vpop.eup %2462 }
 0xb56   :  { %v1620_v25 = vsel %vm355_vm4, %v2463_v12, 0.0  ;;  %v2465_v27 = vpop.eup %2464 }
 0xb57   :  { %1621 = vadd.xlane.f32.xlu0 %v1620_v25  ;;  %v1625_v55 = vmul.f32 %v2465_v27, %v2461_v7  ;;  %v1925_v7 = vld [vmem:[%s3060_s8 + $0x30] sm:$0xff]  ;;  %v2058_v27 = vld [vmem:[%s3062_s10 + $0xc0] sm:$0xff] }
 0xb58   :  { %v2044_v25 = vld [vmem:[%s3062_s10 + $0x50] sm:$0xff] }
 0xb6d   :  { %1627 = vrot.lane.b32.xlu0 %v2677_v51, %s2502_s15  ;;  %v1780_v51 = vld [vmem:[%s3056_s4 + $0x38] sm:$0xff] }
 0xbe0   :  { %v1622_v26 = vpop.xlane.xlu0 %1621 }
 0xbe1   :  { %2466 = vrcp.f32 %v1622_v26  ;;  %v2043_v26 = vld [vmem:[%s3062_s10 + $0x48] sm:$0xff] }
 0xbe4   :  { %v1628_v28 = vpop.permute.xlu0 %1627 }
 0xbe5   :  { %2388 = vmatpush3.msra.mxu0 %v1628_v28  ;;  %v2042_v28 = vld [vmem:[%s3062_s10 + $0x40] sm:$0xff] }
 0xbe6   :  { %2390 = vmatmul.mubr.msk.f32.vlgmr.msra.gmra.mxu0 %vm355_vm4, %v1625_v55  ;;  %2397 = vmatprep.subr.mxu0 %v1780_v51  ;;  %v2057_v55 = vld [vmem:[%s3062_s10 + $0xb8] sm:$0xff] }
 0xbe7   :  { %2398 = vmatpush3.msra.mxu0 %v1780_v51  ;;  %v2040_v51 = vld [vmem:[%s3062_s10 + $0x30] sm:$0xff] }
 0xbe8   :  { %2399 = vmatprep.subr.mxu0 %v1779_v48 }
 0xbe9   :  { %2400 = vmatpush3.msra.mxu0 %v1779_v48  ;;  %v2055_v48 = vld [vmem:[%s3062_s10 + $0xa8] sm:$0xff] }
 0xbee   :  { %v2467_v29 = vpop.eup %2466 }
 0xbef   :  { %v1626_v31 = vmul.f32 %v2467_v29, %v2463_v12  ;;  %v2060_v12 = vld [vmem:[%s3062_s10 + $0xd0] sm:$0xff]  ;;  %v2041_v29 = vld [vmem:[%s3062_s10 + $0x38] sm:$0xff] }
 0xbf1   :  { %2395 = vmatmul.mubr.msk.f32.vlgmr.msra.gmra.mxu1 %vm355_vm4, %v1626_v31  ;;  %v2056_v31 = vld [vmem:[%s3062_s10 + $0xb0] sm:$0xff] }
 0xbf2   :  { %2017 = vmatprep.mubr.f32.mxu1 %v2494_v30  ;;  %1970 = vmatpush1.msra.mxu1 %v1933_v61  ;;  %v2050_v61 = vld [vmem:[%s3062_s10 + $0x80] sm:$0xff] }
 0xbf3   :  { %1971 = vmatprep.subr.mxu1 %v1932_v62  ;;  %v2034_v62 = vld [vmem:[%s3062_s10] sm:$0xff] }
 0xbf4   :  { %1972 = vmatpush1.msra.mxu1 %v1931_v63  ;;  %v1939_v63 = vsub.s32 0, %v2685_v53 }
 0xbf5   :  { %1973 = vmatprep.subr.mxu1 %v1930_v2  ;;  %v1935_v2 = vld [vmem:[%s3061_s9] sm:$0x3] }
 0xbf6   :  { %1974 = vmatpush1.msra.mxu1 %v1929_v3  ;;  %v1943_v3 = vsub.s32 1, %v2685_v53  ;;  %v2209_v53 = vld [vmem:[%s3063_s11] ss:$0 sm:$0xff] }
 0xbf7   :  { %1975 = vmatprep.subr.mxu1 %v1928_v4  ;;  %v1940_v4 = vrot.slane %v1935_v2, %v1939_v63 }
 0xbf8   :  { %1976 = vmatpush1.msra.mxu1 %v1927_v5  ;;  %v1944_v5 = vrot.slane %v1935_v2, %v1943_v3 }
 0xbf9   :  { %1977 = vmatprep.subr.mxu1 %v1926_v6 }
 0xbfa   :  { %1978 = vmatpush1.msra.mxu1 %v1925_v7 }
 0xbfb   :  { %1979 = vmatprep.subr.mxu1 %v1924_v8 }
 0xbfc   :  { %1980 = vmatpush1.msra.mxu1 %v1923_v9 }
 0xbfd   :  { %1981 = vmatprep.subr.mxu1 %v1922_v10 }
 0xbfe   :  { %1982 = vmatpush1.msra.mxu1 %v1921_v13 }
 0xca6   :  { %v1699_v32 = vpop.f32.mrf.mxu0 }
 0xca7   :  { %2401 = vmatprep.mubr.msk.f32.mxu0 %vm197_vm2, %v1699_v32  ;;  %v2039_v32 = vld [vmem:[%s3062_s10 + $0x28] sm:$0xff] }
 0xca8   :  { %v2391_v33 = vpop.f32.mrf.mxu0 }
 0xca9   :  { %v2054_v33 = vld [vmem:[%s3062_s10 + $0xa0] sm:$0xff] }
 0xcb1   :  { %v1775_v34 = vpop.f32.mrf.mxu1 }
 0xcb2   :  { %2402 = vmatmul.mubr.msk.f32.vlgmr.msra.gmra.mxu0 %vm197_vm2, %v1775_v34  ;;  %v2038_v34 = vld [vmem:[%s3062_s10 + $0x20] sm:$0xff] }
 0xcb3   :  { %v2396_v35 = vpop.f32.mrf.mxu1 }
 0xd72   :  { %v2403_v36 = vpop.f32.mrf.mxu0 }
 0xd73   :  { %v1863_v38 = vadd.f32 %v2403_v36, %v1444_v14  ;;  %v1920_v14 = vld [vmem:[%s3060_s8 + $0x8] sm:$0xff] }
 0xd74   :  { %v1853_v39 = vpop.f32.mrf.mxu0  ;;  %1983 = vmatprep.subr.mxu1 %v1920_v14 }
 0xd75   :  { %v1872_v40 = vadd.f32 %v2204_v37, %v1863_v38  ;;  %v1862_v41 = vadd.f32 %v1853_v39, %v1443_v16  ;;  %1984 = vmatpush1.msra.mxu1 %v1919_v15  ;;  %v2065_v16 = vld [vmem:[%s3062_s10 + $0xf8] sm:$0xff] }
 0xd76   :  { %2258 = vmatprep.subr.mxu0 %v2065_v16 }
 0xd77   :  { %v2861_v42 = vadd.f32 %v1872_v40, %v2579_v1  ;;  %v1871_v43 = vadd.f32 %v2204_v37, %v1862_v41  ;;  %2259 = vmatpush3.msra.mxu0 %v2049_v17 }
 0xd78   :  { %2260 = vmatprep.subr.mxu0 %v2064_v18 }
 0xd79   :  { %v2864_v44 = vadd.f32 %v1871_v43, %v2574_v0  ;;  %v1878_v45 = vsel %vm44_vm0, %v2861_v42, 0.0  ;;  %2261 = vmatpush3.msra.mxu0 %v2048_v19 }
 0xd7a   :  { %1879 = vadd.xlane.f32.xlu0 %v1878_v45  ;;  %2262 = vmatprep.subr.mxu0 %v2063_v20 }
 0xd7b   :  { %v1875_v46 = vsel %vm44_vm0, %v2864_v44, 0.0  ;;  %2263 = vmatpush3.msra.mxu0 %v2047_v21 }
 0xd7c   :  { %1876 = vadd.xlane.f32.xlu1 %v1875_v46  ;;  %2264 = vmatprep.subr.mxu0 %v2062_v11 }
 0xd7d   :  { %2265 = vmatpush3.msra.mxu0 %v2046_v22 }
 0xd7e   :  { %2266 = vmatprep.subr.mxu0 %v2061_v23 }
 0xd7f   :  { %2267 = vmatpush3.msra.mxu0 %v2045_v24 }
 0xd80   :  { %2268 = vmatprep.subr.mxu0 %v2060_v12 }
 0xd81   :  { %2269 = vmatpush3.msra.mxu0 %v2044_v25 }
 0xd82   :  { %2270 = vmatprep.subr.mxu0 %v2059_v57 }
 0xd83   :  { %2271 = vmatpush3.msra.mxu0 %v2043_v26 }
 0xd84   :  { %2272 = vmatprep.subr.mxu0 %v2058_v27 }
 0xd85   :  { %2273 = vmatpush3.msra.mxu0 %v2042_v28 }
 0xd86   :  { %2274 = vmatprep.subr.mxu0 %v2057_v55 }
 0xd87   :  { %2275 = vmatpush3.msra.mxu0 %v2041_v29 }
 0xd88   :  { %2276 = vmatprep.subr.mxu0 %v2056_v31 }
 0xd89   :  { %2277 = vmatpush3.msra.mxu0 %v2040_v51 }
 0xd8a   :  { %2278 = vmatprep.subr.mxu0 %v2055_v48 }
 0xd8b   :  { %2279 = vmatpush3.msra.mxu0 %v2039_v32 }
 0xd8c   :  { %2280 = vmatprep.subr.mxu0 %v2054_v33 }
 0xd8d   :  { %2281 = vmatpush3.msra.mxu0 %v2038_v34 }
 0xe03   :  { %v1880_v49 = vpop.xlane.xlu0 %1879 }
 0xe04   :  { %v1882_v50 = vmul.f32 0.015625, %v1880_v49  ;;  %v2205_v49 = vld [vmem:[%s3058_s6] ss:$0 sm:$0xff] }
 0xe05   :  { %v1877_v52 = vpop.xlane.xlu1 %1876 }
 0xe06   :  { %v2871_v47 = vsub.f32 %v2861_v42, %v1882_v50  ;;  %v1881_v1 = vmul.f32 0.015625, %v1877_v52  ;;  %v2206_v52 = vld [vmem:[%s3059_s7] ss:$0 sm:$0xff] }
 0xe08   :  { %v2874_v54 = vsub.f32 %v2864_v44, %v1881_v1  ;;  %v1886_v0 = vmul.f32 %v2871_v47, %v2871_v47 }
 0xe0a   :  { %v1890_v56 = vsel %vm44_vm0, %v1886_v0, 0.0  ;;  %v1885_v58 = vmul.f32 %v2874_v54, %v2874_v54 }
 0xe0b   :  { %1891 = vadd.xlane.f32.xlu1 %v1890_v56 }
 0xe0c   :  { %v1887_v59 = vsel %vm44_vm0, %v1885_v58, 0.0  ;;  %v2052_v58 = vld [vmem:[%s3062_s10 + $0x90] sm:$0xff] }
 0xe0d   :  { %1888 = vadd.xlane.f32.xlu0 %v1887_v59  ;;  %v2051_v59 = vld [vmem:[%s3062_s10 + $0x88] sm:$0xff] }
 0xe94   :  { %v1892_v35 = vpop.xlane.xlu1 %1891 }
 0xe95   :  { %v1894_v36 = vmul.f32 0.015625, %v1892_v35 }
 0xe96   :  { %v1889_v37 = vpop.xlane.xlu0 %1888 }
 0xe97   :  { %v1896_v38 = vadd.f32 1e-05, %v1894_v36  ;;  %v1893_v39 = vmul.f32 0.015625, %v1889_v37 }
 0xe99   :  { %2468 = vrsqrt.f32 %v1896_v38  ;;  %v1895_v40 = vadd.f32 1e-05, %v1893_v39 }
 0xe9b   :  { %2470 = vrsqrt.f32 %v1895_v40 }
 0xea6   :  { %v2469_v41 = vpop.eup %2468 }
 0xea7   :  { %v1900_v46 = vmul.f32 %v2469_v41, %v2871_v47  ;;  %v2053_v47 = vld [vmem:[%s3062_s10 + $0x98] sm:$0xff] }
 0xea8   :  { %v2471_v43 = vpop.eup %2470  ;;  %2282 = vmatprep.subr.mxu0 %v2053_v47 }
 0xea9   :  { %v1899_v45 = vmul.f32 %v2471_v43, %v2874_v54  ;;  %v1909_v0 = vmul.f32 %v2205_v49, %v1900_v46  ;;  %v2037_v54 = vld [vmem:[%s3062_s10 + $0x18] sm:$0xff] }
 0xeaa   :  { %2283 = vmatpush3.msra.mxu0 %v2037_v54 }
 0xeab   :  { %v1908_v50 = vmul.f32 %v2205_v49, %v1899_v45  ;;  %v1918_v56 = vadd.f32 %v2206_v52, %v1909_v0  ;;  %2284 = vmatprep.subr.mxu0 %v2052_v58 }
 0xead   :  { %v1917_v1 = vadd.f32 %v2206_v52, %v1908_v50 }
 0xeaf   :  { %2207 = vmatmul.mubr.msk.f32.vlgmr.msra.gmra.mxu1 %vm44_vm0, %v1917_v1 }
 0xeb0   :  { %2023 = vmatprep.mubr.f32.mxu1 %v2494_v30  ;;  %v2036_v30 = vld [vmem:[%s3062_s10 + $0x10] sm:$0xff] }
 0xeb1   :  { %2285 = vmatpush3.msra.mxu0 %v2036_v30 }
 0xeb2   :  { %2286 = vmatprep.subr.mxu0 %v2051_v59 }
 0xeb3   :  { %2208 = vmatmul.mubr.msk.f32.gmra.mxu1 %vm44_vm0, %v1918_v56  ;;  %2287 = vmatpush3.msra.mxu0 %v2035_v60 }
 0xeb4   :  { %2288 = vmatprep.subr.mxu0 %v2050_v61 }
 0xeb5   :  { %2289 = vmatpush3.msra.mxu0 %v2034_v62 }
 0xf6f   :  { %v2019_v6 = vpop.f32.mrf.mxu1 }
 0xf70   :  { %v2020_v7 = vadd.f32 %v2019_v6, %v1940_v4 }
 0xf71   :  { %v2021_v8 = vpop.f32.mrf.mxu1 }
 0xf72   :  { %v2022_v9 = vadd.f32 %v2021_v8, %v1944_v5  ;;  %v2030_v14 = vmax.f32 %v2020_v7, 0.0 }
 0xf73   :  { %v2025_v10 = vpop.f32.mrf.mxu1 }
 0xf74   :  { %v2031_v13 = vmax.f32 %v2022_v9, 0.0  ;;  %v2026_v15 = vadd.f32 %v2025_v10, %v1940_v4 }
 0xf75   :  { %v2027_v16 = vpop.f32.mrf.mxu1 }
 0xf76   :  { %v2028_v17 = vadd.f32 %v2027_v16, %v1944_v5  ;;  %2137 = vmatprep.mubr.f32.mxu0 %v2031_v13  ;;  %v2032_v19 = vmax.f32 %v2026_v15, 0.0 }
 0xf77   :  { %2138 = vmatmul.mubr.f32.vlgmr.msra.gmra.mxu0 %v2030_v14 }
 0xf78   :  { %v2033_v18 = vmax.f32 %v2028_v17, 0.0 }
 0xf7a   :  { %2142 = vmatprep.mubr.f32.mxu0 %v2033_v18 }
 0xf7b   :  { %2143 = vmatmul.mubr.f32.gmra.mxu0 %v2032_v19 }
0x1037   :  { %v2290_v20 = vpop.f32.mrf.mxu0 }
0x1039   :  { %v2291_v21 = vpop.f32.mrf.mxu0 }
0x103a   :  { %v2292_v11 = vadd.f32 %v2291_v21, %v2290_v20 }
0x103b   :  { %v2293_v22 = vpop.f32.mrf.mxu0 }
0x103c   :  { %v2140_v23 = vadd.f32 %v2292_v11, %v2209_v53 }
0x103d   :  { %v2294_v24 = vpop.f32.mrf.mxu0 }
0x103e   :  { %v2148_v12 = vadd.f32 %v2140_v23, %v2864_v44  ;;  %v2295_v25 = vadd.f32 %v2294_v24, %v2293_v22 }
0x1040   :  { %2150 = vst.msk [vmem:[#allocation2] sm:$0xff] %vm44_vm0, %v2148_v12  ;;  %v2145_v57 = vadd.f32 %v2295_v25, %v2209_v53 }
0x1042   :  { %v2149_v26 = vadd.f32 %v2145_v57, %v2861_v42 }
0x1044   :  { %2151 = vst.msk [vmem:[#allocation2 + $0x8] sm:$0xff] %vm44_vm0, %v2149_v26 }
0x1045   :  { %2483 = shalt.err (!%p2480_p4)
}
0x1046   :  { %s2504_s11 = smov 128   ;;  %s2505_s0 = smov 8  }
0x1047   :  { %2163 = dma.vmem_to_hbm [thread:$0]  %s2158_s23, 256, %s3064_s12, [#allocation3], %s2504_s11, %s2504_s11, %s2505_s0  }
0x1048   :  { %2492 = dma.done.wait [#allocation3], 256  }
0x1049   :  { %2493 = vsyncadd [#allocation3], 4294967040 }
0x104a   :  { %2167 = vsyncpa [#allocation3], 1 }

</bundles_post_ra>
